<compile_context>
chip_gen: v6e
topology: v6e:2x2x1
jax: 0.10.0
libtpu: 0.0.40
codegen_flags: <defaults>
</compile_context>

<pallas_src>
import functools

import jax
import jax.numpy as jnp
from jax import lax
from jax.experimental import pallas as pl
from jax.experimental.pallas import tpu as pltpu


# ------------------------------ Pallas kernel -------------------------------

def _lstm_fused_kernel(x_ref, *rest, num_layers, hidden_size):
    """Fused multi-layer LSTM + Linear(H, 1) on the last timestep.

    x_ref:   (T, Bp, D)            time-major, batch padded to Bp
    per layer: wih_ref (Din, 4H), whh_ref (H, 4H), b_ref (1, 4H)  [b_ih+b_hh]
    fcw_ref: (H, 1)    fcb_ref: (1, 1)
    out_ref: (Bp, 1)
    """
    layer_refs = [rest[3 * l:3 * l + 3] for l in range(num_layers)]
    fcw_ref, fcb_ref, out_ref = rest[3 * num_layers:3 * num_layers + 3]

    T, Bp, D = x_ref.shape
    H = hidden_size

    # Hoisted lane mask selecting the g-gate (tanh) columns of (Bp, 4H).
    lane = lax.broadcasted_iota(jnp.int32, (Bp, 4 * H), 1)
    g_mask = (lane >= 2 * H) & (lane < 3 * H)

    layer_in = x_ref[...].reshape(T * Bp, D)            # (T*Bp, Din)

    h_last = None
    for l, (wih_ref, whh_ref, b_ref) in enumerate(layer_refs):
        is_last = l == num_layers - 1
        whh = whh_ref[...]                              # (H, 4H), hoisted

        # Input projection + bias for ALL timesteps as one MXU matmul.
        xproj = (jnp.dot(layer_in, wih_ref[...],
                         preferred_element_type=jnp.float32)
                 + b_ref[...]).reshape(T, Bp, 4 * H)

        h = jnp.zeros((Bp, H), jnp.float32)
        c = jnp.zeros((Bp, H), jnp.float32)
        hs = []
        # Fully-unrolled serial recurrence; h/c stay register-resident.
        for t in range(T):
            gates = xproj[t] + jnp.dot(h, whh,
                                       preferred_element_type=jnp.float32)
            # Full-vreg nonlinearities; pick tanh lanes for gate g.
            act = jnp.where(g_mask, jnp.tanh(gates), jax.nn.sigmoid(gates))
            i = act[:, 0 * H:1 * H]
            f = act[:, 1 * H:2 * H]
            g = act[:, 2 * H:3 * H]
            o = act[:, 3 * H:4 * H]
            c = f * c + i * g
            h = o * jnp.tanh(c)
            if not is_last:
                hs.append(h)

        if is_last:
            h_last = h
        else:
            # Next layer's input stays on-chip (no HBM writeback/reload).
            layer_in = jnp.concatenate(hs, axis=0)      # (T*Bp, H)
            # TODO(synk): nn.LSTM inter-layer dropout(p=0.05) is train-mode
            # only; omitted for this inference forward.

    # Fused FC head: MXU dot, single small store.
    out_ref[...] = (jnp.dot(h_last, fcw_ref[...],
                            preferred_element_type=jnp.float32)
                    + fcb_ref[...])


# ------------------------------- JAX wrapper ---------------------------------

def lstm_model_forward(x_btd, params, num_layers):
    """Equivalent of LSTM.forward: x (B, T, D) -> (B, 1). h0 = c0 = 0."""
    B, T, D = x_btd.shape
    H = params["layers"][0][1].shape[1]                 # w_hh: (4H, H)

    # Pad batch to the f32 sublane width so vregs / matmul rows are dense.
    Bp = ((B + 7) // 8) * 8
    x = jnp.transpose(x_btd, (1, 0, 2))                 # (T, B, D) time-major
    if Bp != B:
        x = jnp.pad(x, ((0, 0), (0, Bp - B), (0, 0)))

    # Pre-transpose weights so the kernel does row-major (in, 4H) matmuls.
    args = [x]
    for (w_ih, w_hh, b_ih, b_hh) in params["layers"]:
        args.append(jnp.transpose(w_ih))                # (Din, 4H)
        args.append(jnp.transpose(w_hh))                # (H, 4H)
        args.append((b_ih + b_hh).reshape(1, 4 * H))    # (1, 4H)
    args.append(jnp.transpose(params["fc_w"]))          # (H, 1)
    args.append(params["fc_b"].reshape(1, 1))           # (1, 1)

    vmem = pl.BlockSpec(memory_space=pltpu.MemorySpace.VMEM)
    kernel = functools.partial(_lstm_fused_kernel,
                               num_layers=num_layers, hidden_size=H)
    out_p = pl.pallas_call(
        kernel,
        out_shape=jax.ShapeDtypeStruct((Bp, 1), jnp.float32),
        in_specs=[vmem] * len(args),
        out_specs=vmem,
    )(*args)
    return out_p[:B]


# ----------------------------- pure-JAX reference ----------------------------

def lstm_model_reference(x_btd, params, num_layers, hidden_size):
    B, T, _ = x_btd.shape
    layer_in = x_btd
    for layer in range(num_layers):
        w_ih, w_hh, b_ih, b_hh = params["layers"][layer]
        h = jnp.zeros((B, hidden_size), jnp.float32)
        c = jnp.zeros((B, hidden_size), jnp.float32)
        outs = []
        for t in range(T):
            gates = layer_in[:, t, :] @ w_ih.T + b_ih + h @ w_hh.T + b_hh
            i, f, g, o = jnp.split(gates, 4, axis=-1)
            i, f, o = jax.nn.sigmoid(i), jax.nn.sigmoid(f), jax.nn.sigmoid(o)
            g = jnp.tanh(g)
            c = f * c + i * g
            h = o * jnp.tanh(c)
            outs.append(h)
        layer_in = jnp.stack(outs, axis=1)
    return layer_in[:, -1, :] @ params["fc_w"].T + params["fc_b"]


# ----------------------------------- main ------------------------------------

if __name__ == "__main__":
    B, T = 2, 8
    input_size, hidden_size, num_layers = 4, 32, 2

    key = jax.random.PRNGKey(0)
    key, xk = jax.random.split(key)
    x = jax.random.normal(xk, (B, T, input_size), dtype=jnp.float32)

    # Deterministic parameter init (PyTorch-style U(-1/sqrt(H), 1/sqrt(H))).
    bound = 1.0 / jnp.sqrt(jnp.float32(hidden_size))
    params = {"layers": []}
    for layer in range(num_layers):
        in_dim = input_size if layer == 0 else hidden_size
        key, k1, k2, k3, k4 = jax.random.split(key, 5)
        w_ih = jax.random.uniform(k1, (4 * hidden_size, in_dim),
                                  minval=-bound, maxval=bound, dtype=jnp.float32)
        w_hh = jax.random.uniform(k2, (4 * hidden_size, hidden_size),
                                  minval=-bound, maxval=bound, dtype=jnp.float32)
        b_ih = jax.random.uniform(k3, (4 * hidden_size,),
                                  minval=-bound, maxval=bound, dtype=jnp.float32)
        b_hh = jax.random.uniform(k4, (4 * hidden_size,),
                                  minval=-bound, maxval=bound, dtype=jnp.float32)
        params["layers"].append((w_ih, w_hh, b_ih, b_hh))
    key, kfw, kfb = jax.random.split(key, 3)
    params["fc_w"] = jax.random.uniform(kfw, (1, hidden_size),
                                        minval=-bound, maxval=bound,
                                        dtype=jnp.float32)
    params["fc_b"] = jax.random.uniform(kfb, (1,),
                                        minval=-bound, maxval=bound,
                                        dtype=jnp.float32)

    out = lstm_model_forward(x, params, num_layers)
    out = jax.block_until_ready(out)
    assert out.shape == (B, 1), out.shape

    ref = lstm_model_reference(x, params, num_layers, hidden_size)
    assert jnp.allclose(out, ref, atol=1e-5, rtol=1e-5), (out, ref)

    print("KERNEL_OK")
</pallas_src>

<mosaic_0001>
module attributes {stable_mosaic.version = 11 : i64} {
  func.func @_lstm_fused_kernel(%arg0: memref<8x8x4xf32, #tpu.memory_space<vmem>>, %arg1: memref<4x128xf32, #tpu.memory_space<vmem>>, %arg2: memref<32x128xf32, #tpu.memory_space<vmem>>, %arg3: memref<1x128xf32, #tpu.memory_space<vmem>>, %arg4: memref<32x128xf32, #tpu.memory_space<vmem>>, %arg5: memref<32x128xf32, #tpu.memory_space<vmem>>, %arg6: memref<1x128xf32, #tpu.memory_space<vmem>>, %arg7: memref<32x1xf32, #tpu.memory_space<vmem>>, %arg8: memref<1x1xf32, #tpu.memory_space<vmem>>, %arg9: memref<8x1xf32, #tpu.memory_space<vmem>>) attributes {dimension_semantics = [], scalar_prefetch = 0 : i64, scratch_operands = 0 : i64, tpu.core_type = #tpu.core_type<tc>} {
    %0 = tpu.iota {dimensions = array<i32: 1>} : vector<8x128xi32>
    %c64_i32 = arith.constant 64 : i32
    %1 = vector.broadcast %c64_i32 : i32 to vector<8x128xi32>
    %2 = arith.cmpi sge, %0, %1 : vector<8x128xi32>
    %c96_i32 = arith.constant 96 : i32
    %3 = vector.broadcast %c96_i32 : i32 to vector<8x128xi32>
    %4 = arith.cmpi slt, %0, %3 : vector<8x128xi32>
    %5 = arith.andi %2, %4 : vector<8x128xi1>
    %c0 = arith.constant 0 : index
    %c0_0 = arith.constant 0 : index
    %c0_1 = arith.constant 0 : index
    %6 = vector.load %arg0[%c0, %c0_0, %c0_1] : memref<8x8x4xf32, #tpu.memory_space<vmem>>, vector<8x8x4xf32>
    %7 = vector.shape_cast %6 : vector<8x8x4xf32> to vector<64x4xf32>
    %c0_2 = arith.constant 0 : index
    %c0_3 = arith.constant 0 : index
    %8 = vector.load %arg2[%c0_2, %c0_3] : memref<32x128xf32, #tpu.memory_space<vmem>>, vector<32x128xf32>
    %c0_4 = arith.constant 0 : index
    %c0_5 = arith.constant 0 : index
    %9 = vector.load %arg1[%c0_4, %c0_5] : memref<4x128xf32, #tpu.memory_space<vmem>>, vector<4x128xf32>
    %cst = arith.constant dense<0.000000e+00> : vector<64x128xf32>
    %10 = tpu.matmul %7, %9, %cst {dimension_numbers = #tpu.dot_dimension_numbers<[1], [0], [0], [1], [0, 0, 1, 1], [], []>} : vector<64x4xf32>, vector<4x128xf32>, vector<64x128xf32> -> vector<64x128xf32>
    %c0_6 = arith.constant 0 : index
    %c0_7 = arith.constant 0 : index
    %11 = vector.load %arg3[%c0_6, %c0_7] : memref<1x128xf32, #tpu.memory_space<vmem>>, vector<1x128xf32>
    %12 = vector.broadcast %11 : vector<1x128xf32> to vector<64x128xf32>
    %13 = arith.addf %10, %12 : vector<64x128xf32>
    %14 = vector.shape_cast %13 : vector<64x128xf32> to vector<8x8x128xf32>
    %cst_8 = arith.constant 0.000000e+00 : f32
    %15 = vector.broadcast %cst_8 : f32 to vector<8x32xf32>
    %cst_9 = arith.constant 0.000000e+00 : f32
    %16 = vector.broadcast %cst_9 : f32 to vector<8x32xf32>
    %17 = vector.extract_strided_slice %14 {offsets = [0, 0, 0], sizes = [1, 8, 128], strides = [1, 1, 1]} : vector<8x8x128xf32> to vector<1x8x128xf32>
    %18 = vector.shape_cast %17 : vector<1x8x128xf32> to vector<8x128xf32>
    %cst_10 = arith.constant dense<0.000000e+00> : vector<8x128xf32>
    %19 = tpu.matmul %15, %8, %cst_10 {dimension_numbers = #tpu.dot_dimension_numbers<[1], [0], [0], [1], [0, 0, 1, 1], [], []>} : vector<8x32xf32>, vector<32x128xf32>, vector<8x128xf32> -> vector<8x128xf32>
    %20 = arith.addf %18, %19 : vector<8x128xf32>
    %21 = math.tanh %20 : vector<8x128xf32>
    %22 = arith.negf %20 : vector<8x128xf32>
    %23 = math.exp %22 : vector<8x128xf32>
    %cst_11 = arith.constant 1.000000e+00 : f32
    %24 = vector.broadcast %cst_11 : f32 to vector<8x128xf32>
    %25 = arith.addf %24, %23 : vector<8x128xf32>
    %26 = arith.divf %24, %25 : vector<8x128xf32>
    %27 = arith.select %5, %21, %26 : vector<8x128xi1>, vector<8x128xf32>
    %28 = vector.extract_strided_slice %27 {offsets = [0, 0], sizes = [8, 32], strides = [1, 1]} : vector<8x128xf32> to vector<8x32xf32>
    %29 = vector.extract_strided_slice %27 {offsets = [0, 32], sizes = [8, 32], strides = [1, 1]} : vector<8x128xf32> to vector<8x32xf32>
    %30 = vector.extract_strided_slice %27 {offsets = [0, 64], sizes = [8, 32], strides = [1, 1]} : vector<8x128xf32> to vector<8x32xf32>
    %31 = vector.extract_strided_slice %27 {offsets = [0, 96], sizes = [8, 32], strides = [1, 1]} : vector<8x128xf32> to vector<8x32xf32>
    %32 = arith.mulf %29, %16 : vector<8x32xf32>
    %33 = arith.mulf %28, %30 : vector<8x32xf32>
    %34 = arith.addf %32, %33 : vector<8x32xf32>
    %35 = math.tanh %34 : vector<8x32xf32>
    %36 = arith.mulf %31, %35 : vector<8x32xf32>
    %37 = vector.extract_strided_slice %14 {offsets = [1, 0, 0], sizes = [1, 8, 128], strides = [1, 1, 1]} : vector<8x8x128xf32> to vector<1x8x128xf32>
    %38 = vector.shape_cast %37 : vector<1x8x128xf32> to vector<8x128xf32>
    %cst_12 = arith.constant dense<0.000000e+00> : vector<8x128xf32>
    %39 = tpu.matmul %36, %8, %cst_12 {dimension_numbers = #tpu.dot_dimension_numbers<[1], [0], [0], [1], [0, 0, 1, 1], [], []>} : vector<8x32xf32>, vector<32x128xf32>, vector<8x128xf32> -> vector<8x128xf32>
    %40 = arith.addf %38, %39 : vector<8x128xf32>
    %41 = math.tanh %40 : vector<8x128xf32>
    %42 = arith.negf %40 : vector<8x128xf32>
    %43 = math.exp %42 : vector<8x128xf32>
    %cst_13 = arith.constant 1.000000e+00 : f32
    %44 = vector.broadcast %cst_13 : f32 to vector<8x128xf32>
    %45 = arith.addf %44, %43 : vector<8x128xf32>
    %46 = arith.divf %44, %45 : vector<8x128xf32>
    %47 = arith.select %5, %41, %46 : vector<8x128xi1>, vector<8x128xf32>
    %48 = vector.extract_strided_slice %47 {offsets = [0, 0], sizes = [8, 32], strides = [1, 1]} : vector<8x128xf32> to vector<8x32xf32>
    %49 = vector.extract_strided_slice %47 {offsets = [0, 32], sizes = [8, 32], strides = [1, 1]} : vector<8x128xf32> to vector<8x32xf32>
    %50 = vector.extract_strided_slice %47 {offsets = [0, 64], sizes = [8, 32], strides = [1, 1]} : vector<8x128xf32> to vector<8x32xf32>
    %51 = vector.extract_strided_slice %47 {offsets = [0, 96], sizes = [8, 32], strides = [1, 1]} : vector<8x128xf32> to vector<8x32xf32>
    %52 = arith.mulf %49, %34 : vector<8x32xf32>
    %53 = arith.mulf %48, %50 : vector<8x32xf32>
    %54 = arith.addf %52, %53 : vector<8x32xf32>
    %55 = math.tanh %54 : vector<8x32xf32>
    %56 = arith.mulf %51, %55 : vector<8x32xf32>
    %57 = vector.extract_strided_slice %14 {offsets = [2, 0, 0], sizes = [1, 8, 128], strides = [1, 1, 1]} : vector<8x8x128xf32> to vector<1x8x128xf32>
    %58 = vector.shape_cast %57 : vector<1x8x128xf32> to vector<8x128xf32>
    %cst_14 = arith.constant dense<0.000000e+00> : vector<8x128xf32>
    %59 = tpu.matmul %56, %8, %cst_14 {dimension_numbers = #tpu.dot_dimension_numbers<[1], [0], [0], [1], [0, 0, 1, 1], [], []>} : vector<8x32xf32>, vector<32x128xf32>, vector<8x128xf32> -> vector<8x128xf32>
    %60 = arith.addf %58, %59 : vector<8x128xf32>
    %61 = math.tanh %60 : vector<8x128xf32>
    %62 = arith.negf %60 : vector<8x128xf32>
    %63 = math.exp %62 : vector<8x128xf32>
    %cst_15 = arith.constant 1.000000e+00 : f32
    %64 = vector.broadcast %cst_15 : f32 to vector<8x128xf32>
    %65 = arith.addf %64, %63 : vector<8x128xf32>
    %66 = arith.divf %64, %65 : vector<8x128xf32>
    %67 = arith.select %5, %61, %66 : vector<8x128xi1>, vector<8x128xf32>
    %68 = vector.extract_strided_slice %67 {offsets = [0, 0], sizes = [8, 32], strides = [1, 1]} : vector<8x128xf32> to vector<8x32xf32>
    %69 = vector.extract_strided_slice %67 {offsets = [0, 32], sizes = [8, 32], strides = [1, 1]} : vector<8x128xf32> to vector<8x32xf32>
    %70 = vector.extract_strided_slice %67 {offsets = [0, 64], sizes = [8, 32], strides = [1, 1]} : vector<8x128xf32> to vector<8x32xf32>
    %71 = vector.extract_strided_slice %67 {offsets = [0, 96], sizes = [8, 32], strides = [1, 1]} : vector<8x128xf32> to vector<8x32xf32>
    %72 = arith.mulf %69, %54 : vector<8x32xf32>
    %73 = arith.mulf %68, %70 : vector<8x32xf32>
    %74 = arith.addf %72, %73 : vector<8x32xf32>
    %75 = math.tanh %74 : vector<8x32xf32>
    %76 = arith.mulf %71, %75 : vector<8x32xf32>
    %77 = vector.extract_strided_slice %14 {offsets = [3, 0, 0], sizes = [1, 8, 128], strides = [1, 1, 1]} : vector<8x8x128xf32> to vector<1x8x128xf32>
    %78 = vector.shape_cast %77 : vector<1x8x128xf32> to vector<8x128xf32>
    %cst_16 = arith.constant dense<0.000000e+00> : vector<8x128xf32>
    %79 = tpu.matmul %76, %8, %cst_16 {dimension_numbers = #tpu.dot_dimension_numbers<[1], [0], [0], [1], [0, 0, 1, 1], [], []>} : vector<8x32xf32>, vector<32x128xf32>, vector<8x128xf32> -> vector<8x128xf32>
    %80 = arith.addf %78, %79 : vector<8x128xf32>
    %81 = math.tanh %80 : vector<8x128xf32>
    %82 = arith.negf %80 : vector<8x128xf32>
    %83 = math.exp %82 : vector<8x128xf32>
    %cst_17 = arith.constant 1.000000e+00 : f32
    %84 = vector.broadcast %cst_17 : f32 to vector<8x128xf32>
    %85 = arith.addf %84, %83 : vector<8x128xf32>
    %86 = arith.divf %84, %85 : vector<8x128xf32>
    %87 = arith.select %5, %81, %86 : vector<8x128xi1>, vector<8x128xf32>
    %88 = vector.extract_strided_slice %87 {offsets = [0, 0], sizes = [8, 32], strides = [1, 1]} : vector<8x128xf32> to vector<8x32xf32>
    %89 = vector.extract_strided_slice %87 {offsets = [0, 32], sizes = [8, 32], strides = [1, 1]} : vector<8x128xf32> to vector<8x32xf32>
    %90 = vector.extract_strided_slice %87 {offsets = [0, 64], sizes = [8, 32], strides = [1, 1]} : vector<8x128xf32> to vector<8x32xf32>
    %91 = vector.extract_strided_slice %87 {offsets = [0, 96], sizes = [8, 32], strides = [1, 1]} : vector<8x128xf32> to vector<8x32xf32>
    %92 = arith.mulf %89, %74 : vector<8x32xf32>
    %93 = arith.mulf %88, %90 : vector<8x32xf32>
    %94 = arith.addf %92, %93 : vector<8x32xf32>
    %95 = math.tanh %94 : vector<8x32xf32>
    %96 = arith.mulf %91, %95 : vector<8x32xf32>
    %97 = vector.extract_strided_slice %14 {offsets = [4, 0, 0], sizes = [1, 8, 128], strides = [1, 1, 1]} : vector<8x8x128xf32> to vector<1x8x128xf32>
    %98 = vector.shape_cast %97 : vector<1x8x128xf32> to vector<8x128xf32>
    %cst_18 = arith.constant dense<0.000000e+00> : vector<8x128xf32>
    %99 = tpu.matmul %96, %8, %cst_18 {dimension_numbers = #tpu.dot_dimension_numbers<[1], [0], [0], [1], [0, 0, 1, 1], [], []>} : vector<8x32xf32>, vector<32x128xf32>, vector<8x128xf32> -> vector<8x128xf32>
    %100 = arith.addf %98, %99 : vector<8x128xf32>
    %101 = math.tanh %100 : vector<8x128xf32>
    %102 = arith.negf %100 : vector<8x128xf32>
    %103 = math.exp %102 : vector<8x128xf32>
    %cst_19 = arith.constant 1.000000e+00 : f32
    %104 = vector.broadcast %cst_19 : f32 to vector<8x128xf32>
    %105 = arith.addf %104, %103 : vector<8x128xf32>
    %106 = arith.divf %104, %105 : vector<8x128xf32>
    %107 = arith.select %5, %101, %106 : vector<8x128xi1>, vector<8x128xf32>
    %108 = vector.extract_strided_slice %107 {offsets = [0, 0], sizes = [8, 32], strides = [1, 1]} : vector<8x128xf32> to vector<8x32xf32>
    %109 = vector.extract_strided_slice %107 {offsets = [0, 32], sizes = [8, 32], strides = [1, 1]} : vector<8x128xf32> to vector<8x32xf32>
    %110 = vector.extract_strided_slice %107 {offsets = [0, 64], sizes = [8, 32], strides = [1, 1]} : vector<8x128xf32> to vector<8x32xf32>
    %111 = vector.extract_strided_slice %107 {offsets = [0, 96], sizes = [8, 32], strides = [1, 1]} : vector<8x128xf32> to vector<8x32xf32>
    %112 = arith.mulf %109, %94 : vector<8x32xf32>
    %113 = arith.mulf %108, %110 : vector<8x32xf32>
    %114 = arith.addf %112, %113 : vector<8x32xf32>
    %115 = math.tanh %114 : vector<8x32xf32>
    %116 = arith.mulf %111, %115 : vector<8x32xf32>
    %117 = vector.extract_strided_slice %14 {offsets = [5, 0, 0], sizes = [1, 8, 128], strides = [1, 1, 1]} : vector<8x8x128xf32> to vector<1x8x128xf32>
    %118 = vector.shape_cast %117 : vector<1x8x128xf32> to vector<8x128xf32>
    %cst_20 = arith.constant dense<0.000000e+00> : vector<8x128xf32>
    %119 = tpu.matmul %116, %8, %cst_20 {dimension_numbers = #tpu.dot_dimension_numbers<[1], [0], [0], [1], [0, 0, 1, 1], [], []>} : vector<8x32xf32>, vector<32x128xf32>, vector<8x128xf32> -> vector<8x128xf32>
    %120 = arith.addf %118, %119 : vector<8x128xf32>
    %121 = math.tanh %120 : vector<8x128xf32>
    %122 = arith.negf %120 : vector<8x128xf32>
    %123 = math.exp %122 : vector<8x128xf32>
    %cst_21 = arith.constant 1.000000e+00 : f32
    %124 = vector.broadcast %cst_21 : f32 to vector<8x128xf32>
    %125 = arith.addf %124, %123 : vector<8x128xf32>
    %126 = arith.divf %124, %125 : vector<8x128xf32>
    %127 = arith.select %5, %121, %126 : vector<8x128xi1>, vector<8x128xf32>
    %128 = vector.extract_strided_slice %127 {offsets = [0, 0], sizes = [8, 32], strides = [1, 1]} : vector<8x128xf32> to vector<8x32xf32>
    %129 = vector.extract_strided_slice %127 {offsets = [0, 32], sizes = [8, 32], strides = [1, 1]} : vector<8x128xf32> to vector<8x32xf32>
    %130 = vector.extract_strided_slice %127 {offsets = [0, 64], sizes = [8, 32], strides = [1, 1]} : vector<8x128xf32> to vector<8x32xf32>
    %131 = vector.extract_strided_slice %127 {offsets = [0, 96], sizes = [8, 32], strides = [1, 1]} : vector<8x128xf32> to vector<8x32xf32>
    %132 = arith.mulf %129, %114 : vector<8x32xf32>
    %133 = arith.mulf %128, %130 : vector<8x32xf32>
    %134 = arith.addf %132, %133 : vector<8x32xf32>
    %135 = math.tanh %134 : vector<8x32xf32>
    %136 = arith.mulf %131, %135 : vector<8x32xf32>
    %137 = vector.extract_strided_slice %14 {offsets = [6, 0, 0], sizes = [1, 8, 128], strides = [1, 1, 1]} : vector<8x8x128xf32> to vector<1x8x128xf32>
    %138 = vector.shape_cast %137 : vector<1x8x128xf32> to vector<8x128xf32>
    %cst_22 = arith.constant dense<0.000000e+00> : vector<8x128xf32>
    %139 = tpu.matmul %136, %8, %cst_22 {dimension_numbers = #tpu.dot_dimension_numbers<[1], [0], [0], [1], [0, 0, 1, 1], [], []>} : vector<8x32xf32>, vector<32x128xf32>, vector<8x128xf32> -> vector<8x128xf32>
    %140 = arith.addf %138, %139 : vector<8x128xf32>
    %141 = math.tanh %140 : vector<8x128xf32>
    %142 = arith.negf %140 : vector<8x128xf32>
    %143 = math.exp %142 : vector<8x128xf32>
    %cst_23 = arith.constant 1.000000e+00 : f32
    %144 = vector.broadcast %cst_23 : f32 to vector<8x128xf32>
    %145 = arith.addf %144, %143 : vector<8x128xf32>
    %146 = arith.divf %144, %145 : vector<8x128xf32>
    %147 = arith.select %5, %141, %146 : vector<8x128xi1>, vector<8x128xf32>
    %148 = vector.extract_strided_slice %147 {offsets = [0, 0], sizes = [8, 32], strides = [1, 1]} : vector<8x128xf32> to vector<8x32xf32>
    %149 = vector.extract_strided_slice %147 {offsets = [0, 32], sizes = [8, 32], strides = [1, 1]} : vector<8x128xf32> to vector<8x32xf32>
    %150 = vector.extract_strided_slice %147 {offsets = [0, 64], sizes = [8, 32], strides = [1, 1]} : vector<8x128xf32> to vector<8x32xf32>
    %151 = vector.extract_strided_slice %147 {offsets = [0, 96], sizes = [8, 32], strides = [1, 1]} : vector<8x128xf32> to vector<8x32xf32>
    %152 = arith.mulf %149, %134 : vector<8x32xf32>
    %153 = arith.mulf %148, %150 : vector<8x32xf32>
    %154 = arith.addf %152, %153 : vector<8x32xf32>
    %155 = math.tanh %154 : vector<8x32xf32>
    %156 = arith.mulf %151, %155 : vector<8x32xf32>
    %157 = vector.extract_strided_slice %14 {offsets = [7, 0, 0], sizes = [1, 8, 128], strides = [1, 1, 1]} : vector<8x8x128xf32> to vector<1x8x128xf32>
    %158 = vector.shape_cast %157 : vector<1x8x128xf32> to vector<8x128xf32>
    %cst_24 = arith.constant dense<0.000000e+00> : vector<8x128xf32>
    %159 = tpu.matmul %156, %8, %cst_24 {dimension_numbers = #tpu.dot_dimension_numbers<[1], [0], [0], [1], [0, 0, 1, 1], [], []>} : vector<8x32xf32>, vector<32x128xf32>, vector<8x128xf32> -> vector<8x128xf32>
    %160 = arith.addf %158, %159 : vector<8x128xf32>
    %161 = math.tanh %160 : vector<8x128xf32>
    %162 = arith.negf %160 : vector<8x128xf32>
    %163 = math.exp %162 : vector<8x128xf32>
    %cst_25 = arith.constant 1.000000e+00 : f32
    %164 = vector.broadcast %cst_25 : f32 to vector<8x128xf32>
    %165 = arith.addf %164, %163 : vector<8x128xf32>
    %166 = arith.divf %164, %165 : vector<8x128xf32>
    %167 = arith.select %5, %161, %166 : vector<8x128xi1>, vector<8x128xf32>
    %168 = vector.extract_strided_slice %167 {offsets = [0, 0], sizes = [8, 32], strides = [1, 1]} : vector<8x128xf32> to vector<8x32xf32>
    %169 = vector.extract_strided_slice %167 {offsets = [0, 32], sizes = [8, 32], strides = [1, 1]} : vector<8x128xf32> to vector<8x32xf32>
    %170 = vector.extract_strided_slice %167 {offsets = [0, 64], sizes = [8, 32], strides = [1, 1]} : vector<8x128xf32> to vector<8x32xf32>
    %171 = vector.extract_strided_slice %167 {offsets = [0, 96], sizes = [8, 32], strides = [1, 1]} : vector<8x128xf32> to vector<8x32xf32>
    %172 = arith.mulf %169, %154 : vector<8x32xf32>
    %173 = arith.mulf %168, %170 : vector<8x32xf32>
    %174 = arith.addf %172, %173 : vector<8x32xf32>
    %175 = math.tanh %174 : vector<8x32xf32>
    %176 = arith.mulf %171, %175 : vector<8x32xf32>
    %177 = tpu.concatenate %36, %56, %76, %96, %116, %136, %156, %176 in 0 : vector<8x32xf32>, vector<8x32xf32>, vector<8x32xf32>, vector<8x32xf32>, vector<8x32xf32>, vector<8x32xf32>, vector<8x32xf32>, vector<8x32xf32> -> vector<64x32xf32>
    %c0_26 = arith.constant 0 : index
    %c0_27 = arith.constant 0 : index
    %178 = vector.load %arg5[%c0_26, %c0_27] : memref<32x128xf32, #tpu.memory_space<vmem>>, vector<32x128xf32>
    %c0_28 = arith.constant 0 : index
    %c0_29 = arith.constant 0 : index
    %179 = vector.load %arg4[%c0_28, %c0_29] : memref<32x128xf32, #tpu.memory_space<vmem>>, vector<32x128xf32>
    %cst_30 = arith.constant dense<0.000000e+00> : vector<64x128xf32>
    %180 = tpu.matmul %177, %179, %cst_30 {dimension_numbers = #tpu.dot_dimension_numbers<[1], [0], [0], [1], [0, 0, 1, 1], [], []>} : vector<64x32xf32>, vector<32x128xf32>, vector<64x128xf32> -> vector<64x128xf32>
    %c0_31 = arith.constant 0 : index
    %c0_32 = arith.constant 0 : index
    %181 = vector.load %arg6[%c0_31, %c0_32] : memref<1x128xf32, #tpu.memory_space<vmem>>, vector<1x128xf32>
    %182 = vector.broadcast %181 : vector<1x128xf32> to vector<64x128xf32>
    %183 = arith.addf %180, %182 : vector<64x128xf32>
    %184 = vector.shape_cast %183 : vector<64x128xf32> to vector<8x8x128xf32>
    %cst_33 = arith.constant 0.000000e+00 : f32
    %185 = vector.broadcast %cst_33 : f32 to vector<8x32xf32>
    %cst_34 = arith.constant 0.000000e+00 : f32
    %186 = vector.broadcast %cst_34 : f32 to vector<8x32xf32>
    %187 = vector.extract_strided_slice %184 {offsets = [0, 0, 0], sizes = [1, 8, 128], strides = [1, 1, 1]} : vector<8x8x128xf32> to vector<1x8x128xf32>
    %188 = vector.shape_cast %187 : vector<1x8x128xf32> to vector<8x128xf32>
    %cst_35 = arith.constant dense<0.000000e+00> : vector<8x128xf32>
    %189 = tpu.matmul %185, %178, %cst_35 {dimension_numbers = #tpu.dot_dimension_numbers<[1], [0], [0], [1], [0, 0, 1, 1], [], []>} : vector<8x32xf32>, vector<32x128xf32>, vector<8x128xf32> -> vector<8x128xf32>
    %190 = arith.addf %188, %189 : vector<8x128xf32>
    %191 = math.tanh %190 : vector<8x128xf32>
    %192 = arith.negf %190 : vector<8x128xf32>
    %193 = math.exp %192 : vector<8x128xf32>
    %cst_36 = arith.constant 1.000000e+00 : f32
    %194 = vector.broadcast %cst_36 : f32 to vector<8x128xf32>
    %195 = arith.addf %194, %193 : vector<8x128xf32>
    %196 = arith.divf %194, %195 : vector<8x128xf32>
    %197 = arith.select %5, %191, %196 : vector<8x128xi1>, vector<8x128xf32>
    %198 = vector.extract_strided_slice %197 {offsets = [0, 0], sizes = [8, 32], strides = [1, 1]} : vector<8x128xf32> to vector<8x32xf32>
    %199 = vector.extract_strided_slice %197 {offsets = [0, 32], sizes = [8, 32], strides = [1, 1]} : vector<8x128xf32> to vector<8x32xf32>
    %200 = vector.extract_strided_slice %197 {offsets = [0, 64], sizes = [8, 32], strides = [1, 1]} : vector<8x128xf32> to vector<8x32xf32>
    %201 = vector.extract_strided_slice %197 {offsets = [0, 96], sizes = [8, 32], strides = [1, 1]} : vector<8x128xf32> to vector<8x32xf32>
    %202 = arith.mulf %199, %186 : vector<8x32xf32>
    %203 = arith.mulf %198, %200 : vector<8x32xf32>
    %204 = arith.addf %202, %203 : vector<8x32xf32>
    %205 = math.tanh %204 : vector<8x32xf32>
    %206 = arith.mulf %201, %205 : vector<8x32xf32>
    %207 = vector.extract_strided_slice %184 {offsets = [1, 0, 0], sizes = [1, 8, 128], strides = [1, 1, 1]} : vector<8x8x128xf32> to vector<1x8x128xf32>
    %208 = vector.shape_cast %207 : vector<1x8x128xf32> to vector<8x128xf32>
    %cst_37 = arith.constant dense<0.000000e+00> : vector<8x128xf32>
    %209 = tpu.matmul %206, %178, %cst_37 {dimension_numbers = #tpu.dot_dimension_numbers<[1], [0], [0], [1], [0, 0, 1, 1], [], []>} : vector<8x32xf32>, vector<32x128xf32>, vector<8x128xf32> -> vector<8x128xf32>
    %210 = arith.addf %208, %209 : vector<8x128xf32>
    %211 = math.tanh %210 : vector<8x128xf32>
    %212 = arith.negf %210 : vector<8x128xf32>
    %213 = math.exp %212 : vector<8x128xf32>
    %cst_38 = arith.constant 1.000000e+00 : f32
    %214 = vector.broadcast %cst_38 : f32 to vector<8x128xf32>
    %215 = arith.addf %214, %213 : vector<8x128xf32>
    %216 = arith.divf %214, %215 : vector<8x128xf32>
    %217 = arith.select %5, %211, %216 : vector<8x128xi1>, vector<8x128xf32>
    %218 = vector.extract_strided_slice %217 {offsets = [0, 0], sizes = [8, 32], strides = [1, 1]} : vector<8x128xf32> to vector<8x32xf32>
    %219 = vector.extract_strided_slice %217 {offsets = [0, 32], sizes = [8, 32], strides = [1, 1]} : vector<8x128xf32> to vector<8x32xf32>
    %220 = vector.extract_strided_slice %217 {offsets = [0, 64], sizes = [8, 32], strides = [1, 1]} : vector<8x128xf32> to vector<8x32xf32>
    %221 = vector.extract_strided_slice %217 {offsets = [0, 96], sizes = [8, 32], strides = [1, 1]} : vector<8x128xf32> to vector<8x32xf32>
    %222 = arith.mulf %219, %204 : vector<8x32xf32>
    %223 = arith.mulf %218, %220 : vector<8x32xf32>
    %224 = arith.addf %222, %223 : vector<8x32xf32>
    %225 = math.tanh %224 : vector<8x32xf32>
    %226 = arith.mulf %221, %225 : vector<8x32xf32>
    %227 = vector.extract_strided_slice %184 {offsets = [2, 0, 0], sizes = [1, 8, 128], strides = [1, 1, 1]} : vector<8x8x128xf32> to vector<1x8x128xf32>
    %228 = vector.shape_cast %227 : vector<1x8x128xf32> to vector<8x128xf32>
    %cst_39 = arith.constant dense<0.000000e+00> : vector<8x128xf32>
    %229 = tpu.matmul %226, %178, %cst_39 {dimension_numbers = #tpu.dot_dimension_numbers<[1], [0], [0], [1], [0, 0, 1, 1], [], []>} : vector<8x32xf32>, vector<32x128xf32>, vector<8x128xf32> -> vector<8x128xf32>
    %230 = arith.addf %228, %229 : vector<8x128xf32>
    %231 = math.tanh %230 : vector<8x128xf32>
    %232 = arith.negf %230 : vector<8x128xf32>
    %233 = math.exp %232 : vector<8x128xf32>
    %cst_40 = arith.constant 1.000000e+00 : f32
    %234 = vector.broadcast %cst_40 : f32 to vector<8x128xf32>
    %235 = arith.addf %234, %233 : vector<8x128xf32>
    %236 = arith.divf %234, %235 : vector<8x128xf32>
    %237 = arith.select %5, %231, %236 : vector<8x128xi1>, vector<8x128xf32>
    %238 = vector.extract_strided_slice %237 {offsets = [0, 0], sizes = [8, 32], strides = [1, 1]} : vector<8x128xf32> to vector<8x32xf32>
    %239 = vector.extract_strided_slice %237 {offsets = [0, 32], sizes = [8, 32], strides = [1, 1]} : vector<8x128xf32> to vector<8x32xf32>
    %240 = vector.extract_strided_slice %237 {offsets = [0, 64], sizes = [8, 32], strides = [1, 1]} : vector<8x128xf32> to vector<8x32xf32>
    %241 = vector.extract_strided_slice %237 {offsets = [0, 96], sizes = [8, 32], strides = [1, 1]} : vector<8x128xf32> to vector<8x32xf32>
    %242 = arith.mulf %239, %224 : vector<8x32xf32>
    %243 = arith.mulf %238, %240 : vector<8x32xf32>
    %244 = arith.addf %242, %243 : vector<8x32xf32>
    %245 = math.tanh %244 : vector<8x32xf32>
    %246 = arith.mulf %241, %245 : vector<8x32xf32>
    %247 = vector.extract_strided_slice %184 {offsets = [3, 0, 0], sizes = [1, 8, 128], strides = [1, 1, 1]} : vector<8x8x128xf32> to vector<1x8x128xf32>
    %248 = vector.shape_cast %247 : vector<1x8x128xf32> to vector<8x128xf32>
    %cst_41 = arith.constant dense<0.000000e+00> : vector<8x128xf32>
    %249 = tpu.matmul %246, %178, %cst_41 {dimension_numbers = #tpu.dot_dimension_numbers<[1], [0], [0], [1], [0, 0, 1, 1], [], []>} : vector<8x32xf32>, vector<32x128xf32>, vector<8x128xf32> -> vector<8x128xf32>
    %250 = arith.addf %248, %249 : vector<8x128xf32>
    %251 = math.tanh %250 : vector<8x128xf32>
    %252 = arith.negf %250 : vector<8x128xf32>
    %253 = math.exp %252 : vector<8x128xf32>
    %cst_42 = arith.constant 1.000000e+00 : f32
    %254 = vector.broadcast %cst_42 : f32 to vector<8x128xf32>
    %255 = arith.addf %254, %253 : vector<8x128xf32>
    %256 = arith.divf %254, %255 : vector<8x128xf32>
    %257 = arith.select %5, %251, %256 : vector<8x128xi1>, vector<8x128xf32>
    %258 = vector.extract_strided_slice %257 {offsets = [0, 0], sizes = [8, 32], strides = [1, 1]} : vector<8x128xf32> to vector<8x32xf32>
    %259 = vector.extract_strided_slice %257 {offsets = [0, 32], sizes = [8, 32], strides = [1, 1]} : vector<8x128xf32> to vector<8x32xf32>
    %260 = vector.extract_strided_slice %257 {offsets = [0, 64], sizes = [8, 32], strides = [1, 1]} : vector<8x128xf32> to vector<8x32xf32>
    %261 = vector.extract_strided_slice %257 {offsets = [0, 96], sizes = [8, 32], strides = [1, 1]} : vector<8x128xf32> to vector<8x32xf32>
    %262 = arith.mulf %259, %244 : vector<8x32xf32>
    %263 = arith.mulf %258, %260 : vector<8x32xf32>
    %264 = arith.addf %262, %263 : vector<8x32xf32>
    %265 = math.tanh %264 : vector<8x32xf32>
    %266 = arith.mulf %261, %265 : vector<8x32xf32>
    %267 = vector.extract_strided_slice %184 {offsets = [4, 0, 0], sizes = [1, 8, 128], strides = [1, 1, 1]} : vector<8x8x128xf32> to vector<1x8x128xf32>
    %268 = vector.shape_cast %267 : vector<1x8x128xf32> to vector<8x128xf32>
    %cst_43 = arith.constant dense<0.000000e+00> : vector<8x128xf32>
    %269 = tpu.matmul %266, %178, %cst_43 {dimension_numbers = #tpu.dot_dimension_numbers<[1], [0], [0], [1], [0, 0, 1, 1], [], []>} : vector<8x32xf32>, vector<32x128xf32>, vector<8x128xf32> -> vector<8x128xf32>
    %270 = arith.addf %268, %269 : vector<8x128xf32>
    %271 = math.tanh %270 : vector<8x128xf32>
    %272 = arith.negf %270 : vector<8x128xf32>
    %273 = math.exp %272 : vector<8x128xf32>
    %cst_44 = arith.constant 1.000000e+00 : f32
    %274 = vector.broadcast %cst_44 : f32 to vector<8x128xf32>
    %275 = arith.addf %274, %273 : vector<8x128xf32>
    %276 = arith.divf %274, %275 : vector<8x128xf32>
    %277 = arith.select %5, %271, %276 : vector<8x128xi1>, vector<8x128xf32>
    %278 = vector.extract_strided_slice %277 {offsets = [0, 0], sizes = [8, 32], strides = [1, 1]} : vector<8x128xf32> to vector<8x32xf32>
    %279 = vector.extract_strided_slice %277 {offsets = [0, 32], sizes = [8, 32], strides = [1, 1]} : vector<8x128xf32> to vector<8x32xf32>
    %280 = vector.extract_strided_slice %277 {offsets = [0, 64], sizes = [8, 32], strides = [1, 1]} : vector<8x128xf32> to vector<8x32xf32>
    %281 = vector.extract_strided_slice %277 {offsets = [0, 96], sizes = [8, 32], strides = [1, 1]} : vector<8x128xf32> to vector<8x32xf32>
    %282 = arith.mulf %279, %264 : vector<8x32xf32>
    %283 = arith.mulf %278, %280 : vector<8x32xf32>
    %284 = arith.addf %282, %283 : vector<8x32xf32>
    %285 = math.tanh %284 : vector<8x32xf32>
    %286 = arith.mulf %281, %285 : vector<8x32xf32>
    %287 = vector.extract_strided_slice %184 {offsets = [5, 0, 0], sizes = [1, 8, 128], strides = [1, 1, 1]} : vector<8x8x128xf32> to vector<1x8x128xf32>
    %288 = vector.shape_cast %287 : vector<1x8x128xf32> to vector<8x128xf32>
    %cst_45 = arith.constant dense<0.000000e+00> : vector<8x128xf32>
    %289 = tpu.matmul %286, %178, %cst_45 {dimension_numbers = #tpu.dot_dimension_numbers<[1], [0], [0], [1], [0, 0, 1, 1], [], []>} : vector<8x32xf32>, vector<32x128xf32>, vector<8x128xf32> -> vector<8x128xf32>
    %290 = arith.addf %288, %289 : vector<8x128xf32>
    %291 = math.tanh %290 : vector<8x128xf32>
    %292 = arith.negf %290 : vector<8x128xf32>
    %293 = math.exp %292 : vector<8x128xf32>
    %cst_46 = arith.constant 1.000000e+00 : f32
    %294 = vector.broadcast %cst_46 : f32 to vector<8x128xf32>
    %295 = arith.addf %294, %293 : vector<8x128xf32>
    %296 = arith.divf %294, %295 : vector<8x128xf32>
    %297 = arith.select %5, %291, %296 : vector<8x128xi1>, vector<8x128xf32>
    %298 = vector.extract_strided_slice %297 {offsets = [0, 0], sizes = [8, 32], strides = [1, 1]} : vector<8x128xf32> to vector<8x32xf32>
    %299 = vector.extract_strided_slice %297 {offsets = [0, 32], sizes = [8, 32], strides = [1, 1]} : vector<8x128xf32> to vector<8x32xf32>
    %300 = vector.extract_strided_slice %297 {offsets = [0, 64], sizes = [8, 32], strides = [1, 1]} : vector<8x128xf32> to vector<8x32xf32>
    %301 = vector.extract_strided_slice %297 {offsets = [0, 96], sizes = [8, 32], strides = [1, 1]} : vector<8x128xf32> to vector<8x32xf32>
    %302 = arith.mulf %299, %284 : vector<8x32xf32>
    %303 = arith.mulf %298, %300 : vector<8x32xf32>
    %304 = arith.addf %302, %303 : vector<8x32xf32>
    %305 = math.tanh %304 : vector<8x32xf32>
    %306 = arith.mulf %301, %305 : vector<8x32xf32>
    %307 = vector.extract_strided_slice %184 {offsets = [6, 0, 0], sizes = [1, 8, 128], strides = [1, 1, 1]} : vector<8x8x128xf32> to vector<1x8x128xf32>
    %308 = vector.shape_cast %307 : vector<1x8x128xf32> to vector<8x128xf32>
    %cst_47 = arith.constant dense<0.000000e+00> : vector<8x128xf32>
    %309 = tpu.matmul %306, %178, %cst_47 {dimension_numbers = #tpu.dot_dimension_numbers<[1], [0], [0], [1], [0, 0, 1, 1], [], []>} : vector<8x32xf32>, vector<32x128xf32>, vector<8x128xf32> -> vector<8x128xf32>
    %310 = arith.addf %308, %309 : vector<8x128xf32>
    %311 = math.tanh %310 : vector<8x128xf32>
    %312 = arith.negf %310 : vector<8x128xf32>
    %313 = math.exp %312 : vector<8x128xf32>
    %cst_48 = arith.constant 1.000000e+00 : f32
    %314 = vector.broadcast %cst_48 : f32 to vector<8x128xf32>
    %315 = arith.addf %314, %313 : vector<8x128xf32>
    %316 = arith.divf %314, %315 : vector<8x128xf32>
    %317 = arith.select %5, %311, %316 : vector<8x128xi1>, vector<8x128xf32>
    %318 = vector.extract_strided_slice %317 {offsets = [0, 0], sizes = [8, 32], strides = [1, 1]} : vector<8x128xf32> to vector<8x32xf32>
    %319 = vector.extract_strided_slice %317 {offsets = [0, 32], sizes = [8, 32], strides = [1, 1]} : vector<8x128xf32> to vector<8x32xf32>
    %320 = vector.extract_strided_slice %317 {offsets = [0, 64], sizes = [8, 32], strides = [1, 1]} : vector<8x128xf32> to vector<8x32xf32>
    %321 = vector.extract_strided_slice %317 {offsets = [0, 96], sizes = [8, 32], strides = [1, 1]} : vector<8x128xf32> to vector<8x32xf32>
    %322 = arith.mulf %319, %304 : vector<8x32xf32>
    %323 = arith.mulf %318, %320 : vector<8x32xf32>
    %324 = arith.addf %322, %323 : vector<8x32xf32>
    %325 = math.tanh %324 : vector<8x32xf32>
    %326 = arith.mulf %321, %325 : vector<8x32xf32>
    %327 = vector.extract_strided_slice %184 {offsets = [7, 0, 0], sizes = [1, 8, 128], strides = [1, 1, 1]} : vector<8x8x128xf32> to vector<1x8x128xf32>
    %328 = vector.shape_cast %327 : vector<1x8x128xf32> to vector<8x128xf32>
    %cst_49 = arith.constant dense<0.000000e+00> : vector<8x128xf32>
    %329 = tpu.matmul %326, %178, %cst_49 {dimension_numbers = #tpu.dot_dimension_numbers<[1], [0], [0], [1], [0, 0, 1, 1], [], []>} : vector<8x32xf32>, vector<32x128xf32>, vector<8x128xf32> -> vector<8x128xf32>
    %330 = arith.addf %328, %329 : vector<8x128xf32>
    %331 = math.tanh %330 : vector<8x128xf32>
    %332 = arith.negf %330 : vector<8x128xf32>
    %333 = math.exp %332 : vector<8x128xf32>
    %cst_50 = arith.constant 1.000000e+00 : f32
    %334 = vector.broadcast %cst_50 : f32 to vector<8x128xf32>
    %335 = arith.addf %334, %333 : vector<8x128xf32>
    %336 = arith.divf %334, %335 : vector<8x128xf32>
    %337 = arith.select %5, %331, %336 : vector<8x128xi1>, vector<8x128xf32>
    %338 = vector.extract_strided_slice %337 {offsets = [0, 0], sizes = [8, 32], strides = [1, 1]} : vector<8x128xf32> to vector<8x32xf32>
    %339 = vector.extract_strided_slice %337 {offsets = [0, 32], sizes = [8, 32], strides = [1, 1]} : vector<8x128xf32> to vector<8x32xf32>
    %340 = vector.extract_strided_slice %337 {offsets = [0, 64], sizes = [8, 32], strides = [1, 1]} : vector<8x128xf32> to vector<8x32xf32>
    %341 = vector.extract_strided_slice %337 {offsets = [0, 96], sizes = [8, 32], strides = [1, 1]} : vector<8x128xf32> to vector<8x32xf32>
    %342 = arith.mulf %339, %324 : vector<8x32xf32>
    %343 = arith.mulf %338, %340 : vector<8x32xf32>
    %344 = arith.addf %342, %343 : vector<8x32xf32>
    %345 = math.tanh %344 : vector<8x32xf32>
    %346 = arith.mulf %341, %345 : vector<8x32xf32>
    %c0_51 = arith.constant 0 : index
    %c0_52 = arith.constant 0 : index
    %347 = vector.load %arg7[%c0_51, %c0_52] : memref<32x1xf32, #tpu.memory_space<vmem>>, vector<32x1xf32>
    %cst_53 = arith.constant dense<0.000000e+00> : vector<8x1xf32>
    %348 = tpu.matmul %346, %347, %cst_53 {dimension_numbers = #tpu.dot_dimension_numbers<[1], [0], [0], [1], [0, 0, 1, 1], [], []>} : vector<8x32xf32>, vector<32x1xf32>, vector<8x1xf32> -> vector<8x1xf32>
    %c0_54 = arith.constant 0 : index
    %c0_55 = arith.constant 0 : index
    %349 = vector.load %arg8[%c0_54, %c0_55] : memref<1x1xf32, #tpu.memory_space<vmem>>, vector<1x1xf32>
    %350 = vector.broadcast %349 : vector<1x1xf32> to vector<8x1xf32>
    %351 = arith.addf %348, %350 : vector<8x1xf32>
    %c0_56 = arith.constant 0 : index
    %c0_57 = arith.constant 0 : index
    %352 = vector.load %arg9[%c0_56, %c0_57] : memref<8x1xf32, #tpu.memory_space<vmem>>, vector<8x1xf32>
    tpu.vector_store %arg9[%c0_56, %c0_57], %351 {strides = array<i32>} : memref<8x1xf32, #tpu.memory_space<vmem>>, vector<8x1xf32>,
    return
  }
}

</mosaic_0001>

<bundles_post_ra>
// kernel: tpu_custom_call.1
= control target key start
LH: loop header
LB: loop body
LE: loop exit
PB: predicated region body
PF: predicated region fallthrough
CT: control target
= control target key end

     0   :  { %vm84_vm0 = vcmask 1043456   ;;  %vm59_vm1 = vcmask 31744   ;;  %v2530_v0 = vmov 0.0   ;;  %vm2531_vm2 = vmmov 0   ;;  %s2533_s23 = smov 32   ;;  %s3053_s1 = inlined_call_operand.vmem [shape: f32[4,128], index: 1, kind: input, shape index: {}]   ;;  %s3054_s2 = inlined_call_operand.vmem [shape: f32[32,128], index: 2, kind: input, shape index: {}]   ;;  %s3055_s0 = inlined_call_operand.vmem [shape: f32[8,8,4], index: 0, kind: input, shape index: {}]   ;;  %s3056_s3 = inlined_call_operand.vmem [shape: f32[1,128], index: 3, kind: input, shape index: {}]   ;;  %s3057_s4 = inlined_call_operand.vmem [shape: f32[32,128], index: 4, kind: input, shape index: {}]   ;;  %s3058_s5 = inlined_call_operand.vmem [shape: f32[32,128], index: 5, kind: input, shape index: {}]   ;;  %s3059_s6 = inlined_call_operand.vmem [shape: f32[1,128], index: 6, kind: input, shape index: {}]   ;;  %s3060_s7 = inlined_call_operand.vmem [shape: f32[32,1], index: 7, kind: input, shape index: {}]   ;;  %s3061_s8 = inlined_call_operand.<no memory space> [shape: f32[1,1], index: 8, kind: input, shape index: {}]   ;;  %s3062_s9 = inlined_call_operand.vmem [shape: f32[8,1], index: 9, kind: output, shape index: {}]  }
   0x1   :  { %2191 = vmatprep.subr.mxu1 %v2530_v0  ;;  %v51_v1 = vld [vmem:[%s3053_s1] sm:$0xf]  ;;  %v2591_v2 = vld [vmem:[%s3054_s2 + $0x18] sm:$0xff]  ;;  %2199 = vmatprep.mubr.msk.f32.mxu1 %vm2531_vm2, %v2530_v0  ;;  %v40_v4 = vld [vmem:[%s3055_s0 + $0x8] sm:$0xff]  ;;  %v34_v18 = vlaneseq  ;;  %vm193_vm6 = vcmask 261120   ;;  %vm2014_vm7 = vcmask 7168  }
   0x2   :  { %v39_v3 = vld [vmem:[%s3055_s0] sm:$0xff]  ;;  %2177 = vmatprep.subr.msk.mxu0 %vm84_vm0, %v51_v1  ;;  %2192 = vmatpush3.msra.mxu1 %v2591_v2  ;;  %v2605_v5 = vld [vmem:[%s3054_s2 + $0x10] sm:$0xff]  ;;  %v2613_v6 = vld [vmem:[%s3054_s2 + $0x8] sm:$0xff] }
   0x3   :  { %2178 = vmatpush3.msk.msra.mxu0 %vm84_vm0, %v51_v1  ;;  %2179 = vmatprep.mubr.msk.f32.mxu0 %vm59_vm1, %v39_v3  ;;  %v2621_v7 = vld [vmem:[%s3054_s2] sm:$0xff]  ;;  %v35_v19 = vand.u32 127, %v34_v18  ;;  %v41_v48 = vld [vmem:[%s3055_s0 + $0x10] sm:$0xff]  ;;  %v42_v49 = vld [vmem:[%s3055_s0 + $0x18] sm:$0xff] }
   0x4   :  { %2193 = vmatprep.subr.mxu1 %v2530_v0  ;;  %2180 = vmatmul.mubr.msk.f32.vlgmr.msra.gmra.mxu0 %vm59_vm1, %v40_v4  ;;  %v2649_v9 = vld [vmem:[%s3056_s3] ss:$0 sm:$0xff]  ;;  %s2532_s3 = smov 64   ;;  %v44_v51 = vld [vmem:[%s3055_s0 + $0x28] sm:$0xff]  ;;  %v45_v52 = vld [vmem:[%s3055_s0 + $0x30] sm:$0xff] }
   0x5   :  { %2194 = vmatpush3.msra.mxu1 %v2605_v5  ;;  %2213 = vmatprep.subr.mxu0 %v2530_v0  ;;  %vm36_vm3 = vcmp.ge.s32.totalorder %v35_v19, 64  ;;  %vm37_vm4 = vcmp.lt.s32.totalorder %v35_v19, 96  ;;  %v43_v50 = vld [vmem:[%s3055_s0 + $0x20] sm:$0xff]  ;;  %v46_v53 = vld [vmem:[%s3055_s0 + $0x38] sm:$0xff]  ;;  %v1929_v20 = vld [vmem:[%s3060_s7 + $0x8] sm:$0xff] }
   0x6   :  { %2195 = vmatprep.subr.mxu1 %v2530_v0  ;;  %2214 = vmatpush3.msra.mxu0 %v2591_v2  ;;  %vm2652_vm5 = vmand %vm36_vm3, %vm37_vm4 }
   0x7   :  { %2196 = vmatpush3.msra.mxu1 %v2613_v6  ;;  %2215 = vmatprep.subr.mxu0 %v2530_v0 }
   0x8   :  { %2197 = vmatprep.subr.mxu1 %v2530_v0  ;;  %2216 = vmatpush3.msra.mxu0 %v2605_v5 }
   0x9   :  { %2198 = vmatpush3.msra.mxu1 %v2621_v7  ;;  %2217 = vmatprep.subr.mxu0 %v2530_v0 }
   0xa   :  { %2200 = vmatmul.mubr.f32.vlgmr.msra.gmra.mxu1 %v2530_v0  ;;  %2202 = vmatprep.subr.mxu1 %v2530_v0 }
   0xb   :  { %2203 = vmatpush3.msra.mxu1 %v2591_v2  ;;  %2210 = vmatprep.mubr.msk.f32.mxu1 %vm2531_vm2, %v2530_v0 }
   0xc   :  { %2204 = vmatprep.subr.mxu1 %v2530_v0  ;;  %2218 = vmatpush3.msra.mxu0 %v2613_v6 }
   0xd   :  { %2205 = vmatpush3.msra.mxu1 %v2605_v5  ;;  %2219 = vmatprep.subr.mxu0 %v2530_v0 }
   0xe   :  { %2206 = vmatprep.subr.mxu1 %v2530_v0  ;;  %2220 = vmatpush3.msra.mxu0 %v2621_v7 }
   0xf   :  { %2207 = vmatpush3.msra.mxu1 %v2613_v6  ;;  %2235 = vmatprep.subr.mxu0 %v2530_v0 }
  0x10   :  { %2208 = vmatprep.subr.mxu1 %v2530_v0  ;;  %2182 = vmatprep.mubr.msk.f32.mxu0 %vm59_vm1, %v41_v48 }
  0x11   :  { %2209 = vmatpush3.msra.mxu1 %v2621_v7  ;;  %2183 = vmatmul.mubr.msk.f32.gmra.mxu0 %vm59_vm1, %v42_v49 }
  0x12   :  { %2224 = vmatprep.subr.mxu1 %v2530_v0  ;;  %2185 = vmatprep.mubr.msk.f32.mxu0 %vm59_vm1, %v43_v50 }
  0x15   :  { %2186 = vmatmul.mubr.msk.f32.gmra.mxu0 %vm59_vm1, %v44_v51 }
  0x16   :  { %2188 = vmatprep.mubr.msk.f32.mxu0 %vm59_vm1, %v45_v52 }
  0x19   :  { %2189 = vmatmul.mubr.msk.f32.gmra.mxu0 %vm59_vm1, %v46_v53 }
  0x1a   :  { %2221 = vmatprep.mubr.msk.f32.mxu0 %vm2531_vm2, %v2530_v0 }
  0xc4   :  { %v2181_v8 = vpop.f32.mrf.mxu0 }
  0xc5   :  { %v160_v33 = vadd.f32 %v2181_v8, %v2649_v9 }
  0xc6   :  { %v154_v10 = vpop.f32.mrf.mxu0 }
  0xc7   :  { %v155_v11 = vadd.f32 %v2649_v9, %v154_v10 }
  0xca   :  { %v263_v12 = vpop.f32.mrf.mxu1 }
  0xcb   :  { %v267_v13 = vadd.f32 %v263_v12, %v155_v11 }
  0xcc   :  { %v2201_v14 = vpop.f32.mrf.mxu1 }
  0xcd   :  { %v2030_v15 = vmul.f32 -1.442695, %v267_v13 }
  0xcf   :  { %2402 = vpow2.f32 %v2030_v15 }
  0xd0   :  { %2404 = vtanh.f32 %v267_v13 }
  0xd1   :  { %v2184_v58 = vpop.f32.mrf.mxu0 }
  0xd3   :  { %v164_v59 = vpop.f32.mrf.mxu0 }
  0xd4   :  { %v165_v1 = vadd.f32 %v2649_v9, %v164_v59 }
  0xd5   :  { %v2723_v60 = vpop.f32.mrf.mxu0 }
  0xd7   :  { %v2725_v61 = vpop.f32.mrf.mxu0 }
  0xd9   :  { %v2727_v62 = vpop.f32.mrf.mxu0 }
  0xdb   :  { %v2729_v63 = vpop.f32.mrf.mxu0 }
  0xdc   :  { %v2403_v16 = vpop.eup %2402 }
  0xdd   :  { %v272_v17 = vadd.f32 1.0, %v2403_v16  ;;  %v2405_v21 = vpop.eup %2404 }
  0xdf   :  { %2406 = vrcp.f32 %v272_v17 }
  0xec   :  { %v2407_v22 = vpop.eup %2406 }
  0xed   :  { %v275_v23 = vsel %vm2652_vm5, %v2405_v21, %v2407_v22 }
  0xee   :  { %278 = vrot.lane.b32.xlu0 %v275_v23, %s2532_s3  ;;  %v276_v26 = vmul.f32 0.0, %v275_v23 }
 0x160   :  { %v279_v24 = vpop.permute.xlu0 %278 }
 0x161   :  { %v281_v25 = vmul.f32 %v279_v24, %v275_v23 }
 0x163   :  { %283 = vrot.lane.b32.xlu0 %v281_v25, %s2533_s23 }
 0x1d5   :  { %v284_v27 = vpop.permute.xlu0 %283 }
 0x1d6   :  { %v286_v28 = vadd.f32 %v284_v27, %v276_v26  ;;  %v170_v26 = vadd.f32 %v2184_v58, %v2649_v9 }
 0x1d8   :  { %2408 = vtanh.f32 %v286_v28 }
 0x1e5   :  { %v2409_v29 = vpop.eup %2408 }
 0x1e6   :  { %289 = vrot.lane.b32.xlu1 %v2409_v29, %s2532_s3 }
 0x258   :  { %v290_v30 = vpop.permute.xlu1 %289 }
 0x259   :  { %v292_v31 = vmul.f32 %v290_v30, %v275_v23 }
 0x25b   :  { %294 = vrot.lane.b32.xlu1 %v292_v31, %s2533_s23 }
 0x2cd   :  { %v2662_v32 = vpop.permute.xlu1 %294 }
 0x2ce   :  { %2211 = vmatmul.mubr.msk.f32.vlgmr.msra.gmra.mxu1 %vm193_vm6, %v2662_v32 }
 0x2cf   :  { %2225 = vmatpush3.msra.mxu1 %v2591_v2  ;;  %2232 = vmatprep.mubr.msk.f32.mxu1 %vm2531_vm2, %v2530_v0 }
 0x2d0   :  { %2226 = vmatprep.subr.mxu1 %v2530_v0 }
 0x2d1   :  { %2227 = vmatpush3.msra.mxu1 %v2605_v5 }
 0x2d2   :  { %2228 = vmatprep.subr.mxu1 %v2530_v0 }
 0x2d3   :  { %2229 = vmatpush3.msra.mxu1 %v2613_v6 }
 0x2d4   :  { %2230 = vmatprep.subr.mxu1 %v2530_v0 }
 0x2d5   :  { %2231 = vmatpush3.msra.mxu1 %v2621_v7 }
 0x2d6   :  { %2246 = vmatprep.subr.mxu1 %v2530_v0 }
 0x38e   :  { %v364_v34 = vpop.f32.mrf.mxu1 }
 0x38f   :  { %v368_v35 = vadd.f32 %v364_v34, %v160_v33 }
 0x390   :  { %v2212_v36 = vpop.f32.mrf.mxu1 }
 0x391   :  { %v2032_v37 = vmul.f32 -1.442695, %v368_v35 }
 0x393   :  { %2410 = vpow2.f32 %v2032_v37 }
 0x394   :  { %2412 = vtanh.f32 %v368_v35 }
 0x3a0   :  { %v2411_v38 = vpop.eup %2410 }
 0x3a1   :  { %v373_v39 = vadd.f32 1.0, %v2411_v38  ;;  %v2413_v40 = vpop.eup %2412 }
 0x3a3   :  { %2414 = vrcp.f32 %v373_v39 }
 0x3b0   :  { %v2415_v41 = vpop.eup %2414 }
 0x3b1   :  { %v376_v42 = vsel %vm2652_vm5, %v2413_v40, %v2415_v41 }
 0x3b2   :  { %379 = vrot.lane.b32.xlu0 %v376_v42, %s2532_s3  ;;  %v377_v45 = vmul.f32 %v376_v42, %v286_v28 }
 0x424   :  { %v380_v43 = vpop.permute.xlu0 %379 }
 0x425   :  { %v382_v44 = vmul.f32 %v380_v43, %v376_v42 }
 0x427   :  { %384 = vrot.lane.b32.xlu1 %v382_v44, %s2533_s23 }
 0x499   :  { %v385_v46 = vpop.permute.xlu1 %384 }
 0x49a   :  { %v387_v47 = vadd.f32 %v385_v46, %v377_v45  ;;  %v175_v46 = vadd.f32 %v2649_v9, %v2725_v61 }
 0x49c   :  { %2416 = vtanh.f32 %v387_v47 }
 0x4a9   :  { %v2417_v54 = vpop.eup %2416 }
 0x4aa   :  { %390 = vrot.lane.b32.xlu0 %v2417_v54, %s2532_s3 }
 0x51c   :  { %v391_v55 = vpop.permute.xlu0 %390 }
 0x51d   :  { %v393_v56 = vmul.f32 %v391_v55, %v376_v42 }
 0x51f   :  { %395 = vrot.lane.b32.xlu1 %v393_v56, %s2533_s23 }
 0x591   :  { %v2709_v57 = vpop.permute.xlu1 %395 }
 0x592   :  { %2222 = vmatmul.mubr.msk.f32.vlgmr.msra.gmra.mxu0 %vm193_vm6, %v2709_v57 }
 0x593   :  { %2236 = vmatpush3.msra.mxu0 %v2591_v2  ;;  %2243 = vmatprep.mubr.msk.f32.mxu0 %vm2531_vm2, %v2530_v0 }
 0x594   :  { %2237 = vmatprep.subr.mxu0 %v2530_v0 }
 0x595   :  { %2238 = vmatpush3.msra.mxu0 %v2605_v5 }
 0x596   :  { %2239 = vmatprep.subr.mxu0 %v2530_v0 }
 0x597   :  { %2240 = vmatpush3.msra.mxu0 %v2613_v6 }
 0x598   :  { %2241 = vmatprep.subr.mxu0 %v2530_v0 }
 0x599   :  { %2242 = vmatpush3.msra.mxu0 %v2621_v7 }
 0x59a   :  { %2257 = vmatprep.subr.mxu0 %v2530_v0 }
 0x652   :  { %v465_v3 = vpop.f32.mrf.mxu0 }
 0x653   :  { %v469_v4 = vadd.f32 %v465_v3, %v165_v1 }
 0x654   :  { %v2223_v8 = vpop.f32.mrf.mxu0 }
 0x655   :  { %v2034_v10 = vmul.f32 -1.442695, %v469_v4 }
 0x657   :  { %2418 = vpow2.f32 %v2034_v10 }
 0x658   :  { %2420 = vtanh.f32 %v469_v4 }
 0x664   :  { %v2419_v11 = vpop.eup %2418 }
 0x665   :  { %v474_v12 = vadd.f32 1.0, %v2419_v11  ;;  %v2421_v13 = vpop.eup %2420 }
 0x667   :  { %2422 = vrcp.f32 %v474_v12 }
 0x674   :  { %v2423_v14 = vpop.eup %2422 }
 0x675   :  { %v477_v15 = vsel %vm2652_vm5, %v2421_v13, %v2423_v14 }
 0x676   :  { %480 = vrot.lane.b32.xlu0 %v477_v15, %s2532_s3  ;;  %v478_v18 = vmul.f32 %v477_v15, %v387_v47 }
 0x6e8   :  { %v481_v16 = vpop.permute.xlu0 %480 }
 0x6e9   :  { %v483_v17 = vmul.f32 %v481_v16, %v477_v15 }
 0x6eb   :  { %485 = vrot.lane.b32.xlu1 %v483_v17, %s2533_s23 }
 0x75d   :  { %v486_v19 = vpop.permute.xlu1 %485 }
 0x75e   :  { %v488_v21 = vadd.f32 %v486_v19, %v478_v18 }
 0x760   :  { %2424 = vtanh.f32 %v488_v21 }
 0x76d   :  { %v2425_v22 = vpop.eup %2424 }
 0x76e   :  { %491 = vrot.lane.b32.xlu0 %v2425_v22, %s2532_s3  ;;  %v1007_v22 = vld [vmem:[%s3057_s4 + $0x18] sm:$0xff] }
 0x7e0   :  { %v492_v23 = vpop.permute.xlu0 %491 }
 0x7e1   :  { %v494_v24 = vmul.f32 %v492_v23, %v477_v15 }
 0x7e3   :  { %496 = vrot.lane.b32.xlu1 %v494_v24, %s2533_s23 }
 0x855   :  { %v2738_v25 = vpop.permute.xlu1 %496 }
 0x856   :  { %2233 = vmatmul.mubr.msk.f32.vlgmr.msra.gmra.mxu1 %vm193_vm6, %v2738_v25 }
 0x857   :  { %2247 = vmatpush3.msra.mxu1 %v2591_v2  ;;  %2254 = vmatprep.mubr.msk.f32.mxu1 %vm2531_vm2, %v2530_v0 }
 0x858   :  { %2248 = vmatprep.subr.mxu1 %v2530_v0 }
 0x859   :  { %2249 = vmatpush3.msra.mxu1 %v2605_v5 }
 0x85a   :  { %2250 = vmatprep.subr.mxu1 %v2530_v0 }
 0x85b   :  { %2251 = vmatpush3.msra.mxu1 %v2613_v6 }
 0x85c   :  { %2252 = vmatprep.subr.mxu1 %v2530_v0 }
 0x85d   :  { %2253 = vmatpush3.msra.mxu1 %v2621_v7 }
 0x85e   :  { %2268 = vmatprep.subr.mxu1 %v2530_v0 }
 0x916   :  { %v566_v27 = vpop.f32.mrf.mxu1 }
 0x917   :  { %v570_v28 = vadd.f32 %v566_v27, %v170_v26 }
 0x918   :  { %v2234_v29 = vpop.f32.mrf.mxu1 }
 0x919   :  { %v2036_v30 = vmul.f32 -1.442695, %v570_v28  ;;  %v1005_v29 = vld [vmem:[%s3057_s4 + $0x8] sm:$0xff] }
 0x91b   :  { %2426 = vpow2.f32 %v2036_v30  ;;  %v1004_v30 = vld [vmem:[%s3057_s4] sm:$0xff] }
 0x91c   :  { %2428 = vtanh.f32 %v570_v28  ;;  %v1006_v28 = vld [vmem:[%s3057_s4 + $0x10] sm:$0xff] }
 0x928   :  { %v2427_v31 = vpop.eup %2426 }
 0x929   :  { %v575_v33 = vadd.f32 1.0, %v2427_v31  ;;  %v2429_v34 = vpop.eup %2428 }
 0x92b   :  { %2430 = vrcp.f32 %v575_v33 }
 0x938   :  { %v2431_v35 = vpop.eup %2430 }
 0x939   :  { %v578_v36 = vsel %vm2652_vm5, %v2429_v34, %v2431_v35 }
 0x93a   :  { %581 = vrot.lane.b32.xlu0 %v578_v36, %s2532_s3  ;;  %v579_v39 = vmul.f32 %v578_v36, %v488_v21 }
 0x9ac   :  { %v582_v37 = vpop.permute.xlu0 %581 }
 0x9ad   :  { %v584_v38 = vmul.f32 %v582_v37, %v578_v36 }
 0x9af   :  { %586 = vrot.lane.b32.xlu1 %v584_v38, %s2533_s23 }
 0xa21   :  { %v587_v40 = vpop.permute.xlu1 %586 }
 0xa22   :  { %v589_v41 = vadd.f32 %v587_v40, %v579_v39 }
 0xa24   :  { %2432 = vtanh.f32 %v589_v41 }
 0xa31   :  { %v2433_v42 = vpop.eup %2432 }
 0xa32   :  { %592 = vrot.lane.b32.xlu0 %v2433_v42, %s2532_s3 }
 0xaa4   :  { %v593_v43 = vpop.permute.xlu0 %592 }
 0xaa5   :  { %v595_v44 = vmul.f32 %v593_v43, %v578_v36 }
 0xaa7   :  { %597 = vrot.lane.b32.xlu1 %v595_v44, %s2533_s23  ;;  %v2836_v44 = vld [vmem:[%s3058_s5 + $0x18] sm:$0xff] }
 0xb19   :  { %v2759_v45 = vpop.permute.xlu1 %597 }
 0xb1a   :  { %2244 = vmatmul.mubr.msk.f32.vlgmr.msra.gmra.mxu0 %vm193_vm6, %v2759_v45 }
 0xb1b   :  { %2258 = vmatpush3.msra.mxu0 %v2591_v2  ;;  %2265 = vmatprep.mubr.msk.f32.mxu0 %vm2531_vm2, %v2530_v0 }
 0xb1c   :  { %2259 = vmatprep.subr.mxu0 %v2530_v0 }
 0xb1d   :  { %2260 = vmatpush3.msra.mxu0 %v2605_v5 }
 0xb1e   :  { %2261 = vmatprep.subr.mxu0 %v2530_v0 }
 0xb1f   :  { %2262 = vmatpush3.msra.mxu0 %v2613_v6 }
 0xb20   :  { %2263 = vmatprep.subr.mxu0 %v2530_v0 }
 0xb21   :  { %2264 = vmatpush3.msra.mxu0 %v2621_v7 }
 0xb22   :  { %2279 = vmatprep.subr.mxu0 %v1007_v22 }
 0xbda   :  { %v667_v47 = vpop.f32.mrf.mxu0 }
 0xbdb   :  { %v671_v48 = vadd.f32 %v667_v47, %v175_v46  ;;  %v2849_v46 = vld [vmem:[%s3058_s5 + $0x8] sm:$0xff]  ;;  %v2856_v47 = vld [vmem:[%s3058_s5] sm:$0xff] }
 0xbdc   :  { %v2245_v49 = vpop.f32.mrf.mxu0 }
 0xbdd   :  { %v2038_v50 = vmul.f32 -1.442695, %v671_v48 }
 0xbdf   :  { %2434 = vpow2.f32 %v2038_v50 }
 0xbe0   :  { %2436 = vtanh.f32 %v671_v48 }
 0xbec   :  { %v2435_v51 = vpop.eup %2434 }
 0xbed   :  { %v676_v52 = vadd.f32 1.0, %v2435_v51  ;;  %v2437_v53 = vpop.eup %2436  ;;  %v190_v51 = vadd.f32 %v2727_v62, %v2649_v9 }
 0xbef   :  { %2438 = vrcp.f32 %v676_v52 }
 0xbfc   :  { %v2439_v54 = vpop.eup %2438 }
 0xbfd   :  { %v679_v55 = vsel %vm2652_vm5, %v2437_v53, %v2439_v54 }
 0xbfe   :  { %682 = vrot.lane.b32.xlu0 %v679_v55, %s2532_s3  ;;  %v680_v59 = vmul.f32 %v679_v55, %v589_v41 }
 0xc70   :  { %v683_v56 = vpop.permute.xlu0 %682 }
 0xc71   :  { %v685_v58 = vmul.f32 %v683_v56, %v679_v55 }
 0xc73   :  { %687 = vrot.lane.b32.xlu1 %v685_v58, %s2533_s23  ;;  %v2892_v58 = vld [vmem:[%s3059_s6] ss:$0 sm:$0xff] }
 0xce5   :  { %v688_v61 = vpop.permute.xlu1 %687 }
 0xce6   :  { %v690_v1 = vadd.f32 %v688_v61, %v680_v59 }
 0xce8   :  { %2440 = vtanh.f32 %v690_v1 }
 0xcf5   :  { %v2441_v3 = vpop.eup %2440 }
 0xcf6   :  { %693 = vrot.lane.b32.xlu0 %v2441_v3, %s2532_s3 }
 0xd68   :  { %v694_v4 = vpop.permute.xlu0 %693 }
 0xd69   :  { %v696_v8 = vmul.f32 %v694_v4, %v679_v55 }
 0xd6b   :  { %698 = vrot.lane.b32.xlu1 %v696_v8, %s2533_s23 }
 0xddd   :  { %v699_v10 = vpop.permute.xlu1 %698 }
 0xdde   :  { %2255 = vmatmul.mubr.msk.f32.vlgmr.msra.gmra.mxu1 %vm193_vm6, %v699_v10 }
 0xddf   :  { %2269 = vmatpush3.msra.mxu1 %v2591_v2  ;;  %2276 = vmatprep.mubr.msk.f32.mxu1 %vm2531_vm2, %v2530_v0  ;;  %v180_v2 = vadd.f32 %v2723_v60, %v2649_v9 }
 0xde0   :  { %2270 = vmatprep.subr.mxu1 %v2530_v0 }
 0xde1   :  { %2271 = vmatpush3.msra.mxu1 %v2605_v5 }
 0xde2   :  { %2272 = vmatprep.subr.mxu1 %v2530_v0 }
 0xde3   :  { %2273 = vmatpush3.msra.mxu1 %v2613_v6 }
 0xde4   :  { %2274 = vmatprep.subr.mxu1 %v2530_v0 }
 0xde5   :  { %2275 = vmatpush3.msra.mxu1 %v2621_v7 }
 0xde6   :  { %2299 = vmatprep.subr.mxu1 %v2530_v0 }
 0xe9e   :  { %v768_v11 = vpop.f32.mrf.mxu1 }
 0xe9f   :  { %v772_v12 = vadd.f32 %v768_v11, %v180_v2 }
 0xea0   :  { %v2256_v13 = vpop.f32.mrf.mxu1 }
 0xea1   :  { %v2040_v14 = vmul.f32 -1.442695, %v772_v12 }
 0xea3   :  { %2442 = vpow2.f32 %v2040_v14 }
 0xea4   :  { %2444 = vtanh.f32 %v772_v12 }
 0xeb0   :  { %v2443_v15 = vpop.eup %2442 }
 0xeb1   :  { %v777_v5 = vadd.f32 1.0, %v2443_v15  ;;  %v2445_v16 = vpop.eup %2444 }
 0xeb3   :  { %2446 = vrcp.f32 %v777_v5 }
 0xec0   :  { %v2447_v6 = vpop.eup %2446 }
 0xec1   :  { %v780_v17 = vsel %vm2652_vm5, %v2445_v16, %v2447_v6 }
 0xec2   :  { %783 = vrot.lane.b32.xlu0 %v780_v17, %s2532_s3  ;;  %v781_v60 = vmul.f32 %v780_v17, %v690_v1 }
 0xf34   :  { %v784_v7 = vpop.permute.xlu0 %783 }
 0xf35   :  { %v786_v18 = vmul.f32 %v784_v7, %v780_v17 }
 0xf37   :  { %788 = vrot.lane.b32.xlu1 %v786_v18, %s2533_s23 }
 0xfa9   :  { %v789_v19 = vpop.permute.xlu1 %788 }
 0xfaa   :  { %v791_v21 = vadd.f32 %v789_v19, %v781_v60 }
 0xfac   :  { %2448 = vtanh.f32 %v791_v21 }
 0xfb9   :  { %v2449_v23 = vpop.eup %2448 }
 0xfba   :  { %794 = vrot.lane.b32.xlu0 %v2449_v23, %s2532_s3 }
0x102c   :  { %v795_v24 = vpop.permute.xlu0 %794 }
0x102d   :  { %v797_v26 = vmul.f32 %v795_v24, %v780_v17 }
0x102f   :  { %799 = vrot.lane.b32.xlu1 %v797_v26, %s2533_s23 }
0x10a1   :  { %v800_v27 = vpop.permute.xlu1 %799 }
0x10a2   :  { %2266 = vmatmul.mubr.msk.f32.vlgmr.msra.gmra.mxu0 %vm193_vm6, %v800_v27 }
0x10a3   :  { %2280 = vmatpush3.msra.mxu0 %v1007_v22  ;;  %2287 = vmatprep.mubr.msk.f32.mxu0 %vm193_vm6, %v2662_v32  ;;  %v185_v32 = vadd.f32 %v2649_v9, %v2729_v63 }
0x10a4   :  { %2281 = vmatprep.subr.mxu0 %v1006_v28 }
0x10a5   :  { %2282 = vmatpush3.msra.mxu0 %v1006_v28 }
0x10a6   :  { %2283 = vmatprep.subr.mxu0 %v1005_v29 }
0x10a7   :  { %2284 = vmatpush3.msra.mxu0 %v1005_v29 }
0x10a8   :  { %2285 = vmatprep.subr.mxu0 %v1004_v30 }
0x10a9   :  { %2286 = vmatpush3.msra.mxu0 %v1004_v30 }
0x10aa   :  { %2288 = vmatmul.mubr.msk.f32.vlgmr.msra.gmra.mxu0 %vm193_vm6, %v2709_v57  ;;  %2321 = vmatprep.subr.mxu0 %v2530_v0 }
0x10ab   :  { %2290 = vmatprep.mubr.msk.f32.mxu0 %vm193_vm6, %v2738_v25  ;;  %2322 = vmatpush3.msra.mxu0 %v2836_v44 }
0x10ac   :  { %2323 = vmatprep.subr.mxu0 %v2530_v0 }
0x10ae   :  { %2291 = vmatmul.mubr.msk.f32.gmra.mxu0 %vm193_vm6, %v2759_v45  ;;  %v2842_v45 = vld [vmem:[%s3058_s5 + $0x10] sm:$0xff] }
0x10af   :  { %2293 = vmatprep.mubr.msk.f32.mxu0 %vm193_vm6, %v699_v10  ;;  %2324 = vmatpush3.msra.mxu0 %v2842_v45 }
0x10b0   :  { %2325 = vmatprep.subr.mxu0 %v2530_v0 }
0x10b1   :  { %2326 = vmatpush3.msra.mxu0 %v2849_v46 }
0x10b2   :  { %2294 = vmatmul.mubr.msk.f32.gmra.mxu0 %vm193_vm6, %v800_v27  ;;  %2327 = vmatprep.subr.mxu0 %v2530_v0 }
0x10b3   :  { %2328 = vmatpush3.msra.mxu0 %v2856_v47 }
0x10b4   :  { %2343 = vmatprep.subr.mxu0 %v2530_v0 }
0x1162   :  { %v869_v31 = vpop.f32.mrf.mxu0 }
0x1163   :  { %v873_v33 = vadd.f32 %v869_v31, %v185_v32 }
0x1164   :  { %v2267_v34 = vpop.f32.mrf.mxu0 }
0x1165   :  { %v2042_v35 = vmul.f32 -1.442695, %v873_v33 }
0x1167   :  { %2450 = vpow2.f32 %v2042_v35 }
0x1168   :  { %2452 = vtanh.f32 %v873_v33 }
0x116a   :  { %v2887_v52 = vpop.f32.mrf.mxu0 }
0x116b   :  { %v1092_v31 = vadd.f32 %v2887_v52, %v2892_v58 }
0x116c   :  { %v1086_v56 = vpop.f32.mrf.mxu0 }
0x116d   :  { %v1087_v59 = vadd.f32 %v2892_v58, %v1086_v56 }
0x1174   :  { %v2451_v57 = vpop.eup %2450 }
0x1175   :  { %v878_v36 = vadd.f32 1.0, %v2451_v57  ;;  %v2453_v25 = vpop.eup %2452 }
0x1177   :  { %2454 = vrcp.f32 %v878_v36 }
0x1184   :  { %v2455_v37 = vpop.eup %2454 }
0x1185   :  { %v881_v38 = vsel %vm2652_vm5, %v2453_v25, %v2455_v37 }
0x1186   :  { %884 = vrot.lane.b32.xlu0 %v881_v38, %s2532_s3  ;;  %v882_v63 = vmul.f32 %v881_v38, %v791_v21 }
0x11f8   :  { %v885_v39 = vpop.permute.xlu0 %884 }
0x11f9   :  { %v887_v40 = vmul.f32 %v885_v39, %v881_v38 }
0x11fb   :  { %889 = vrot.lane.b32.xlu1 %v887_v40, %s2533_s23 }
0x126d   :  { %v890_v41 = vpop.permute.xlu1 %889 }
0x126e   :  { %v2829_v42 = vadd.f32 %v890_v41, %v882_v63 }
0x1270   :  { %2456 = vtanh.f32 %v2829_v42 }
0x127d   :  { %v2457_v43 = vpop.eup %2456 }
0x127e   :  { %895 = vrot.lane.b32.xlu0 %v2457_v43, %s2532_s3 }
0x12f0   :  { %v896_v48 = vpop.permute.xlu0 %895 }
0x12f1   :  { %v898_v49 = vmul.f32 %v896_v48, %v881_v38 }
0x12f3   :  { %900 = vrot.lane.b32.xlu1 %v898_v49, %s2533_s23 }
0x1365   :  { %v901_v50 = vpop.permute.xlu1 %900 }
0x1366   :  { %2277 = vmatmul.mubr.msk.f32.vlgmr.msra.gmra.mxu1 %vm193_vm6, %v901_v50  ;;  %2296 = vmatprep.mubr.msk.f32.mxu0 %vm193_vm6, %v901_v50 }
0x1367   :  { %2300 = vmatpush3.msra.mxu1 %v2836_v44  ;;  %2307 = vmatprep.mubr.msk.f32.mxu1 %vm2531_vm2, %v2530_v0 }
0x1368   :  { %2301 = vmatprep.subr.mxu1 %v2530_v0 }
0x1369   :  { %2302 = vmatpush3.msra.mxu1 %v2842_v45 }
0x136a   :  { %2303 = vmatprep.subr.mxu1 %v2530_v0 }
0x136b   :  { %2304 = vmatpush3.msra.mxu1 %v2849_v46 }
0x136c   :  { %2305 = vmatprep.subr.mxu1 %v2530_v0 }
0x136d   :  { %2306 = vmatpush3.msra.mxu1 %v2856_v47 }
0x136e   :  { %2308 = vmatmul.mubr.f32.vlgmr.msra.gmra.mxu1 %v2530_v0  ;;  %2310 = vmatprep.subr.mxu1 %v2530_v0 }
0x136f   :  { %2311 = vmatpush3.msra.mxu1 %v2836_v44  ;;  %2318 = vmatprep.mubr.msk.f32.mxu1 %vm2531_vm2, %v2530_v0 }
0x1370   :  { %2312 = vmatprep.subr.mxu1 %v2530_v0 }
0x1371   :  { %2313 = vmatpush3.msra.mxu1 %v2842_v45 }
0x1372   :  { %2314 = vmatprep.subr.mxu1 %v2530_v0 }
0x1373   :  { %2315 = vmatpush3.msra.mxu1 %v2849_v46 }
0x1374   :  { %2316 = vmatprep.subr.mxu1 %v2530_v0 }
0x1375   :  { %2317 = vmatpush3.msra.mxu1 %v2856_v47 }
0x1376   :  { %2332 = vmatprep.subr.mxu1 %v2530_v0 }
0x1426   :  { %v970_v53 = vpop.f32.mrf.mxu1 }
0x1427   :  { %v974_v54 = vadd.f32 %v970_v53, %v190_v51  ;;  %v2292_v53 = vpop.f32.mrf.mxu0 }
0x1428   :  { %v2278_v55 = vpop.f32.mrf.mxu1 }
0x1429   :  { %v2044_v13 = vmul.f32 -1.442695, %v974_v54 }
0x142e   :  { %v1191_v61 = vpop.f32.mrf.mxu1 }
0x142f   :  { %v1195_v1 = vadd.f32 %v1191_v61, %v1087_v59 }
0x1430   :  { %v2309_v3 = vpop.f32.mrf.mxu1 }
0x1431   :  { %v2054_v4 = vmul.f32 -1.442695, %v1195_v1 }
0x1433   :  { %2458 = vpow2.f32 %v2054_v4 }
0x1434   :  { %2460 = vtanh.f32 %v1195_v1 }
0x1440   :  { %v2459_v8 = vpop.eup %2458 }
0x1441   :  { %v1200_v9 = vadd.f32 1.0, %v2459_v8  ;;  %v2461_v62 = vpop.eup %2460 }
0x1443   :  { %2462 = vrcp.f32 %v1200_v9 }
0x1444   :  { %2464 = vpow2.f32 %v2044_v13 }
0x1450   :  { %v2463_v10 = vpop.eup %2462 }
0x1451   :  { %v1203_v2 = vsel %vm2652_vm5, %v2461_v62, %v2463_v10  ;;  %v2465_v14 = vpop.eup %2464 }
0x1452   :  { %1206 = vrot.lane.b32.xlu0 %v1203_v2, %s2532_s3  ;;  %v1204_v15 = vmul.f32 0.0, %v1203_v2  ;;  %v979_v5 = vadd.f32 1.0, %v2465_v14 }
0x14c4   :  { %v1207_v11 = vpop.permute.xlu0 %1206 }
0x14c5   :  { %v1209_v12 = vmul.f32 %v1207_v11, %v1203_v2 }
0x14c7   :  { %1211 = vrot.lane.b32.xlu1 %v1209_v12, %s2533_s23 }
0x1539   :  { %v1212_v16 = vpop.permute.xlu1 %1211 }
0x153a   :  { %v1214_v6 = vadd.f32 %v1212_v16, %v1204_v15 }
0x153c   :  { %2466 = vtanh.f32 %v1214_v6 }
0x153d   :  { %2468 = vrcp.f32 %v979_v5 }
0x153e   :  { %2470 = vtanh.f32 %v974_v54  ;;  %v1096_v54 = vpop.f32.mrf.mxu0 }
0x153f   :  { %v1097_v1 = vadd.f32 %v2892_v58, %v1096_v54 }
0x1540   :  { %v2941_v55 = vpop.f32.mrf.mxu0 }
0x1542   :  { %v2943_v56 = vpop.f32.mrf.mxu0 }
0x1549   :  { %v2467_v17 = vpop.eup %2466 }
0x154a   :  { %v2469_v7 = vpop.eup %2468  ;;  %1217 = vrot.lane.b32.xlu0 %v2467_v17, %s2532_s3 }
0x154b   :  { %v2471_v18 = vpop.eup %2470 }
0x154c   :  { %v982_v60 = vsel %vm2652_vm5, %v2471_v18, %v2469_v7 }
0x154d   :  { %v983_v26 = vmul.f32 %v982_v60, %v2829_v42 }
0x154e   :  { %985 = vrot.lane.b32.xlu0 %v982_v60, %s2532_s3 }
0x15bc   :  { %v1218_v19 = vpop.permute.xlu0 %1217 }
0x15bd   :  { %v1220_v21 = vmul.f32 %v1218_v19, %v1203_v2 }
0x15bf   :  { %1222 = vrot.lane.b32.xlu1 %v1220_v21, %s2533_s23 }
0x15c0   :  { %v986_v22 = vpop.permute.xlu0 %985 }
0x15c1   :  { %v988_v23 = vmul.f32 %v986_v22, %v982_v60 }
0x15c3   :  { %990 = vrot.lane.b32.xlu0 %v988_v23, %s2533_s23 }
0x1631   :  { %v1223_v24 = vpop.permute.xlu1 %1222 }
0x1632   :  { %2319 = vmatmul.mubr.msk.f32.vlgmr.msra.gmra.mxu1 %vm193_vm6, %v1223_v24 }
0x1633   :  { %2333 = vmatpush3.msra.mxu1 %v2836_v44  ;;  %2340 = vmatprep.mubr.msk.f32.mxu1 %vm2531_vm2, %v2530_v0 }
0x1634   :  { %2334 = vmatprep.subr.mxu1 %v2530_v0 }
0x1635   :  { %v991_v27 = vpop.permute.xlu0 %990  ;;  %2335 = vmatpush3.msra.mxu1 %v2842_v45 }
0x1636   :  { %v993_v28 = vadd.f32 %v991_v27, %v983_v26  ;;  %2336 = vmatprep.subr.mxu1 %v2530_v0 }
0x1637   :  { %2337 = vmatpush3.msra.mxu1 %v2849_v46 }
0x1638   :  { %2472 = vtanh.f32 %v993_v28  ;;  %2338 = vmatprep.subr.mxu1 %v2530_v0 }
0x1639   :  { %2339 = vmatpush3.msra.mxu1 %v2856_v47 }
0x163a   :  { %2354 = vmatprep.subr.mxu1 %v2530_v0 }
0x1645   :  { %v2473_v29 = vpop.eup %2472 }
0x1646   :  { %996 = vrot.lane.b32.xlu0 %v2473_v29, %s2532_s3 }
0x16b8   :  { %v997_v30 = vpop.permute.xlu0 %996 }
0x16b9   :  { %v999_v32 = vmul.f32 %v997_v30, %v982_v60  ;;  %v1102_v60 = vadd.f32 %v2292_v53, %v2892_v58 }
0x16bb   :  { %1016 = vrot.lane.b32.xlu0 %v999_v32, %s2533_s23 }
0x16f2   :  { %v1292_v33 = vpop.f32.mrf.mxu1 }
0x16f3   :  { %v1296_v34 = vadd.f32 %v1292_v33, %v1092_v31 }
0x16f4   :  { %v2320_v35 = vpop.f32.mrf.mxu1 }
0x16f5   :  { %v2056_v57 = vmul.f32 -1.442695, %v1296_v34 }
0x16f7   :  { %2474 = vpow2.f32 %v2056_v57 }
0x16f8   :  { %2476 = vtanh.f32 %v1296_v34 }
0x1704   :  { %v2475_v36 = vpop.eup %2474 }
0x1705   :  { %v1301_v25 = vadd.f32 1.0, %v2475_v36  ;;  %v2477_v37 = vpop.eup %2476 }
0x1707   :  { %2478 = vrcp.f32 %v1301_v25 }
0x1714   :  { %v2479_v38 = vpop.eup %2478 }
0x1715   :  { %v1304_v39 = vsel %vm2652_vm5, %v2477_v37, %v2479_v38  ;;  %v1107_v37 = vadd.f32 %v2892_v58, %v2943_v56 }
0x1716   :  { %1307 = vrot.lane.b32.xlu1 %v1304_v39, %s2532_s3  ;;  %v1305_v42 = vmul.f32 %v1304_v39, %v1214_v6 }
0x172d   :  { %v1017_v40 = vpop.permute.xlu0 %1016 }
0x172e   :  { %2297 = vmatmul.mubr.msk.f32.gmra.mxu0 %vm193_vm6, %v1017_v40 }
0x172f   :  { %2329 = vmatprep.mubr.msk.f32.mxu0 %vm2531_vm2, %v2530_v0 }
0x1788   :  { %v1308_v63 = vpop.permute.xlu1 %1307 }
0x1789   :  { %v1310_v41 = vmul.f32 %v1308_v63, %v1304_v39 }
0x178b   :  { %1312 = vrot.lane.b32.xlu1 %v1310_v41, %s2533_s23 }
0x17ee   :  { %v2945_v59 = vpop.f32.mrf.mxu0 }
0x17f0   :  { %v2947_v61 = vpop.f32.mrf.mxu0 }
0x17fd   :  { %v1313_v43 = vpop.permute.xlu1 %1312 }
0x17fe   :  { %v1315_v48 = vadd.f32 %v1313_v43, %v1305_v42 }
0x1800   :  { %2480 = vtanh.f32 %v1315_v48 }
0x180d   :  { %v2481_v49 = vpop.eup %2480 }
0x180e   :  { %1318 = vrot.lane.b32.xlu1 %v2481_v49, %s2532_s3 }
0x1880   :  { %v1319_v50 = vpop.permute.xlu1 %1318 }
0x1881   :  { %v1321_v51 = vmul.f32 %v1319_v50, %v1304_v39 }
0x1883   :  { %1323 = vrot.lane.b32.xlu1 %v1321_v51, %s2533_s23 }
0x18f5   :  { %v1324_v52 = vpop.permute.xlu1 %1323 }
0x18f6   :  { %2330 = vmatmul.mubr.msk.f32.vlgmr.msra.gmra.mxu0 %vm193_vm6, %v1324_v52 }
0x18f7   :  { %2344 = vmatpush3.msra.mxu0 %v2836_v44  ;;  %2351 = vmatprep.mubr.msk.f32.mxu0 %vm2531_vm2, %v2530_v0 }
0x18f8   :  { %2345 = vmatprep.subr.mxu0 %v2530_v0 }
0x18f9   :  { %2346 = vmatpush3.msra.mxu0 %v2842_v45 }
0x18fa   :  { %2347 = vmatprep.subr.mxu0 %v2530_v0 }
0x18fb   :  { %2348 = vmatpush3.msra.mxu0 %v2849_v46 }
0x18fc   :  { %2349 = vmatprep.subr.mxu0 %v2530_v0 }
0x18fd   :  { %2350 = vmatpush3.msra.mxu0 %v2856_v47 }
0x18fe   :  { %2365 = vmatprep.subr.mxu0 %v2530_v0 }
0x19b6   :  { %v1393_v3 = vpop.f32.mrf.mxu0 }
0x19b7   :  { %v1397_v4 = vadd.f32 %v1393_v3, %v1097_v1 }
0x19b8   :  { %v2331_v8 = vpop.f32.mrf.mxu0 }
0x19b9   :  { %v2058_v9 = vmul.f32 -1.442695, %v1397_v4  ;;  %v1112_v8 = vadd.f32 %v2941_v55, %v2892_v58 }
0x19bb   :  { %2482 = vpow2.f32 %v2058_v9 }
0x19bc   :  { %2484 = vtanh.f32 %v1397_v4 }
0x19c8   :  { %v2483_v62 = vpop.eup %2482 }
0x19c9   :  { %v1402_v10 = vadd.f32 1.0, %v2483_v62  ;;  %v2485_v2 = vpop.eup %2484 }
0x19cb   :  { %2486 = vrcp.f32 %v1402_v10 }
0x19d8   :  { %v2487_v11 = vpop.eup %2486 }
0x19d9   :  { %v1405_v12 = vsel %vm2652_vm5, %v2485_v2, %v2487_v11 }
0x19da   :  { %1408 = vrot.lane.b32.xlu0 %v1405_v12, %s2532_s3  ;;  %v1406_v15 = vmul.f32 %v1405_v12, %v1315_v48 }
0x1a4c   :  { %v1409_v13 = vpop.permute.xlu0 %1408 }
0x1a4d   :  { %v1411_v14 = vmul.f32 %v1409_v13, %v1405_v12 }
0x1a4f   :  { %1413 = vrot.lane.b32.xlu1 %v1411_v14, %s2533_s23 }
0x1ac1   :  { %v1414_v5 = vpop.permute.xlu1 %1413 }
0x1ac2   :  { %v1416_v16 = vadd.f32 %v1414_v5, %v1406_v15 }
0x1ac4   :  { %2488 = vtanh.f32 %v1416_v16 }
0x1ad1   :  { %v2489_v6 = vpop.eup %2488 }
0x1ad2   :  { %1419 = vrot.lane.b32.xlu0 %v2489_v6, %s2532_s3 }
0x1b44   :  { %v1420_v17 = vpop.permute.xlu0 %1419 }
0x1b45   :  { %v1422_v7 = vmul.f32 %v1420_v17, %v1405_v12 }
0x1b47   :  { %1424 = vrot.lane.b32.xlu1 %v1422_v7, %s2533_s23  ;;  %v1117_v7 = vadd.f32 %v2892_v58, %v2947_v61 }
0x1bb9   :  { %v1425_v18 = vpop.permute.xlu1 %1424 }
0x1bba   :  { %2341 = vmatmul.mubr.msk.f32.vlgmr.msra.gmra.mxu1 %vm193_vm6, %v1425_v18 }
0x1bbb   :  { %2355 = vmatpush3.msra.mxu1 %v2836_v44  ;;  %2362 = vmatprep.mubr.msk.f32.mxu1 %vm2531_vm2, %v2530_v0 }
0x1bbc   :  { %2356 = vmatprep.subr.mxu1 %v2530_v0 }
0x1bbd   :  { %2357 = vmatpush3.msra.mxu1 %v2842_v45 }
0x1bbe   :  { %2358 = vmatprep.subr.mxu1 %v2530_v0 }
0x1bbf   :  { %2359 = vmatpush3.msra.mxu1 %v2849_v46 }
0x1bc0   :  { %2360 = vmatprep.subr.mxu1 %v2530_v0 }
0x1bc1   :  { %2361 = vmatpush3.msra.mxu1 %v2856_v47 }
0x1bc2   :  { %2376 = vmatprep.subr.mxu1 %v2530_v0 }
0x1c7a   :  { %v1494_v19 = vpop.f32.mrf.mxu1 }
0x1c7b   :  { %v1498_v21 = vadd.f32 %v1494_v19, %v1102_v60 }
0x1c7c   :  { %v2342_v22 = vpop.f32.mrf.mxu1 }
0x1c7d   :  { %v2060_v23 = vmul.f32 -1.442695, %v1498_v21 }
0x1c7f   :  { %2490 = vpow2.f32 %v2060_v23 }
0x1c80   :  { %2492 = vtanh.f32 %v1498_v21 }
0x1c8c   :  { %v2491_v24 = vpop.eup %2490 }
0x1c8d   :  { %v1503_v26 = vadd.f32 1.0, %v2491_v24  ;;  %v2493_v27 = vpop.eup %2492 }
0x1c8f   :  { %2494 = vrcp.f32 %v1503_v26 }
0x1c9c   :  { %v2495_v28 = vpop.eup %2494 }
0x1c9d   :  { %v1506_v29 = vsel %vm2652_vm5, %v2493_v27, %v2495_v28 }
0x1c9e   :  { %1509 = vrot.lane.b32.xlu0 %v1506_v29, %s2532_s3  ;;  %v1507_v31 = vmul.f32 %v1506_v29, %v1416_v16 }
0x1d10   :  { %v1510_v30 = vpop.permute.xlu0 %1509 }
0x1d11   :  { %v1512_v32 = vmul.f32 %v1510_v30, %v1506_v29 }
0x1d13   :  { %1514 = vrot.lane.b32.xlu1 %v1512_v32, %s2533_s23 }
0x1d85   :  { %v1515_v33 = vpop.permute.xlu1 %1514 }
0x1d86   :  { %v1517_v34 = vadd.f32 %v1515_v33, %v1507_v31 }
0x1d88   :  { %2496 = vtanh.f32 %v1517_v34 }
0x1d95   :  { %v2497_v35 = vpop.eup %2496 }
0x1d96   :  { %1520 = vrot.lane.b32.xlu0 %v2497_v35, %s2532_s3 }
0x1e08   :  { %v1521_v57 = vpop.permute.xlu0 %1520 }
0x1e09   :  { %v1523_v36 = vmul.f32 %v1521_v57, %v1506_v29  ;;  %v1122_v57 = vadd.f32 %v2945_v59, %v2892_v58 }
0x1e0b   :  { %1525 = vrot.lane.b32.xlu1 %v1523_v36, %s2533_s23 }
0x1e7d   :  { %v1526_v25 = vpop.permute.xlu1 %1525 }
0x1e7e   :  { %2352 = vmatmul.mubr.msk.f32.vlgmr.msra.gmra.mxu0 %vm193_vm6, %v1526_v25 }
0x1e7f   :  { %2366 = vmatpush3.msra.mxu0 %v2836_v44  ;;  %2373 = vmatprep.mubr.msk.f32.mxu0 %vm2531_vm2, %v2530_v0 }
0x1e80   :  { %2367 = vmatprep.subr.mxu0 %v2530_v0 }
0x1e81   :  { %2368 = vmatpush3.msra.mxu0 %v2842_v45 }
0x1e82   :  { %2369 = vmatprep.subr.mxu0 %v2530_v0 }
0x1e83   :  { %2370 = vmatpush3.msra.mxu0 %v2849_v46 }
0x1e84   :  { %2371 = vmatprep.subr.mxu0 %v2530_v0 }
0x1e85   :  { %2372 = vmatpush3.msra.mxu0 %v2856_v47 }
0x1e86   :  { %2387 = vmatprep.subr.mxu0 %v2530_v0 }
0x1f3e   :  { %v1595_v38 = vpop.f32.mrf.mxu0 }
0x1f3f   :  { %v1599_v39 = vadd.f32 %v1595_v38, %v1107_v37 }
0x1f40   :  { %v2353_v40 = vpop.f32.mrf.mxu0 }
0x1f41   :  { %v2062_v63 = vmul.f32 -1.442695, %v1599_v39 }
0x1f43   :  { %2498 = vpow2.f32 %v2062_v63 }
0x1f44   :  { %2500 = vtanh.f32 %v1599_v39 }
0x1f50   :  { %v2499_v41 = vpop.eup %2498 }
0x1f51   :  { %v1604_v42 = vadd.f32 1.0, %v2499_v41  ;;  %v2501_v43 = vpop.eup %2500 }
0x1f53   :  { %2502 = vrcp.f32 %v1604_v42 }
0x1f60   :  { %v2503_v48 = vpop.eup %2502 }
0x1f61   :  { %v1607_v49 = vsel %vm2652_vm5, %v2501_v43, %v2503_v48 }
0x1f62   :  { %1610 = vrot.lane.b32.xlu0 %v1607_v49, %s2532_s3  ;;  %v1608_v52 = vmul.f32 %v1607_v49, %v1517_v34 }
0x1fd4   :  { %v1611_v50 = vpop.permute.xlu0 %1610 }
0x1fd5   :  { %v1613_v51 = vmul.f32 %v1611_v50, %v1607_v49  ;;  %v1931_v50 = vld [vmem:[%s3060_s7 + $0x18] sm:$0xff] }
0x1fd7   :  { %1615 = vrot.lane.b32.xlu1 %v1613_v51, %s2533_s23  ;;  %v1930_v51 = vld [vmem:[%s3060_s7 + $0x10] sm:$0xff] }
0x2049   :  { %v1616_v53 = vpop.permute.xlu1 %1615 }
0x204a   :  { %v1618_v54 = vadd.f32 %v1616_v53, %v1608_v52  ;;  %v1928_v52 = vld [vmem:[%s3060_s7] sm:$0xff] }
0x204c   :  { %2504 = vtanh.f32 %v1618_v54 }
0x2059   :  { %v2505_v56 = vpop.eup %2504 }
0x205a   :  { %1621 = vrot.lane.b32.xlu0 %v2505_v56, %s2532_s3 }
0x20cc   :  { %v1622_v1 = vpop.permute.xlu0 %1621 }
0x20cd   :  { %v1624_v3 = vmul.f32 %v1622_v1, %v1607_v49 }
0x20cf   :  { %1626 = vrot.lane.b32.xlu1 %v1624_v3, %s2533_s23 }
0x2141   :  { %v1627_v4 = vpop.permute.xlu1 %1626 }
0x2142   :  { %2363 = vmatmul.mubr.msk.f32.vlgmr.msra.gmra.mxu1 %vm193_vm6, %v1627_v4 }
0x2143   :  { %2377 = vmatpush3.msra.mxu1 %v2836_v44  ;;  %2384 = vmatprep.mubr.msk.f32.mxu1 %vm2531_vm2, %v2530_v0 }
0x2144   :  { %2378 = vmatprep.subr.mxu1 %v2530_v0 }
0x2145   :  { %2379 = vmatpush3.msra.mxu1 %v2842_v45 }
0x2146   :  { %2380 = vmatprep.subr.mxu1 %v2530_v0 }
0x2147   :  { %2381 = vmatpush3.msra.mxu1 %v2849_v46 }
0x2148   :  { %2382 = vmatprep.subr.mxu1 %v2530_v0 }
0x2149   :  { %2383 = vmatpush3.msra.mxu1 %v2856_v47 }
0x2202   :  { %v1696_v9 = vpop.f32.mrf.mxu1 }
0x2203   :  { %v1700_v44 = vadd.f32 %v1696_v9, %v1112_v8 }
0x2204   :  { %v2364_v62 = vpop.f32.mrf.mxu1 }
0x2205   :  { %v2064_v10 = vmul.f32 -1.442695, %v1700_v44 }
0x2207   :  { %2506 = vpow2.f32 %v2064_v10 }
0x2208   :  { %2508 = vtanh.f32 %v1700_v44 }
0x2214   :  { %v2507_v2 = vpop.eup %2506 }
0x2215   :  { %v1705_v11 = vadd.f32 1.0, %v2507_v2  ;;  %v2509_v45 = vpop.eup %2508 }
0x2217   :  { %2510 = vrcp.f32 %v1705_v11 }
0x2224   :  { %v2511_v12 = vpop.eup %2510 }
0x2225   :  { %v1708_v46 = vsel %vm2652_vm5, %v2509_v45, %v2511_v12 }
0x2226   :  { %1711 = vrot.lane.b32.xlu0 %v1708_v46, %s2532_s3  ;;  %v1709_v55 = vmul.f32 %v1708_v46, %v1618_v54  ;;  %v14_v54 = vstv %s3061_s8 }
0x2227   :  { %15 = vst [vmem:[#allocation2] sm:$0x1] %v14_v54 }
0x222e   :  { %v2069_v4 = vld [vmem:[#allocation2] ss:$0 sm:$0xff] }
0x2298   :  { %v1712_v47 = vpop.permute.xlu0 %1711 }
0x2299   :  { %v1714_v13 = vmul.f32 %v1712_v47, %v1708_v46 }
0x229b   :  { %1716 = vrot.lane.b32.xlu1 %v1714_v13, %s2533_s23 }
0x230d   :  { %v1717_v14 = vpop.permute.xlu1 %1716 }
0x230e   :  { %v1719_v15 = vadd.f32 %v1717_v14, %v1709_v55 }
0x2310   :  { %2512 = vtanh.f32 %v1719_v15 }
0x231d   :  { %v2513_v5 = vpop.eup %2512 }
0x231e   :  { %1722 = vrot.lane.b32.xlu0 %v2513_v5, %s2532_s3 }
0x2390   :  { %v1723_v16 = vpop.permute.xlu0 %1722 }
0x2391   :  { %v1725_v6 = vmul.f32 %v1723_v16, %v1708_v46 }
0x2393   :  { %1727 = vrot.lane.b32.xlu1 %v1725_v6, %s2533_s23 }
0x2405   :  { %v1728_v17 = vpop.permute.xlu1 %1727 }
0x2406   :  { %2374 = vmatmul.mubr.msk.f32.vlgmr.msra.gmra.mxu0 %vm193_vm6, %v1728_v17 }
0x2407   :  { %2395 = vmatprep.mubr.msk.f32.mxu0 %vm2531_vm2, %v2530_v0  ;;  %2388 = vmatpush3.msra.mxu0 %v1931_v50 }
0x2408   :  { %2389 = vmatprep.subr.mxu0 %v2530_v0 }
0x2409   :  { %2390 = vmatpush3.msra.mxu0 %v1930_v51 }
0x240a   :  { %2391 = vmatprep.subr.mxu0 %v2530_v0 }
0x240b   :  { %2392 = vmatpush3.msra.mxu0 %v1929_v20 }
0x240c   :  { %2393 = vmatprep.subr.mxu0 %v2530_v0 }
0x240d   :  { %2394 = vmatpush3.msra.mxu0 %v1928_v52 }
0x24c6   :  { %v1797_v18 = vpop.f32.mrf.mxu0 }
0x24c7   :  { %v1801_v60 = vadd.f32 %v1797_v18, %v1117_v7 }
0x24c8   :  { %v2375_v19 = vpop.f32.mrf.mxu0 }
0x24c9   :  { %v2066_v21 = vmul.f32 -1.442695, %v1801_v60 }
0x24cb   :  { %2514 = vpow2.f32 %v2066_v21 }
0x24cc   :  { %2516 = vtanh.f32 %v1801_v60 }
0x24d8   :  { %v2515_v22 = vpop.eup %2514 }
0x24d9   :  { %v1806_v23 = vadd.f32 1.0, %v2515_v22  ;;  %v2517_v24 = vpop.eup %2516 }
0x24db   :  { %2518 = vrcp.f32 %v1806_v23 }
0x24e8   :  { %v2519_v26 = vpop.eup %2518 }
0x24e9   :  { %v1809_v27 = vsel %vm2652_vm5, %v2517_v24, %v2519_v26 }
0x24ea   :  { %1812 = vrot.lane.b32.xlu0 %v1809_v27, %s2532_s3  ;;  %v1810_v61 = vmul.f32 %v1809_v27, %v1719_v15 }
0x255c   :  { %v1813_v28 = vpop.permute.xlu0 %1812 }
0x255d   :  { %v1815_v29 = vmul.f32 %v1813_v28, %v1809_v27 }
0x255f   :  { %1817 = vrot.lane.b32.xlu1 %v1815_v29, %s2533_s23 }
0x25d1   :  { %v1818_v30 = vpop.permute.xlu1 %1817 }
0x25d2   :  { %v1820_v32 = vadd.f32 %v1818_v30, %v1810_v61 }
0x25d4   :  { %2520 = vtanh.f32 %v1820_v32 }
0x25e1   :  { %v2521_v31 = vpop.eup %2520 }
0x25e2   :  { %1823 = vrot.lane.b32.xlu0 %v2521_v31, %s2532_s3 }
0x2654   :  { %v1824_v33 = vpop.permute.xlu0 %1823 }
0x2655   :  { %v1826_v34 = vmul.f32 %v1824_v33, %v1809_v27 }
0x2657   :  { %1828 = vrot.lane.b32.xlu1 %v1826_v34, %s2533_s23 }
0x26c9   :  { %v1829_v35 = vpop.permute.xlu1 %1828 }
0x26ca   :  { %2385 = vmatmul.mubr.msk.f32.vlgmr.msra.gmra.mxu1 %vm193_vm6, %v1829_v35 }
0x278a   :  { %v1898_v36 = vpop.f32.mrf.mxu1 }
0x278b   :  { %v1902_v25 = vadd.f32 %v1898_v36, %v1122_v57 }
0x278c   :  { %v2386_v37 = vpop.f32.mrf.mxu1 }
0x278d   :  { %v2068_v38 = vmul.f32 -1.442695, %v1902_v25 }
0x278f   :  { %2522 = vpow2.f32 %v2068_v38 }
0x2790   :  { %2524 = vtanh.f32 %v1902_v25 }
0x279c   :  { %v2523_v39 = vpop.eup %2522 }
0x279d   :  { %v1907_v40 = vadd.f32 1.0, %v2523_v39  ;;  %v2525_v63 = vpop.eup %2524 }
0x279f   :  { %2526 = vrcp.f32 %v1907_v40 }
0x27ac   :  { %v2527_v41 = vpop.eup %2526 }
0x27ad   :  { %v1910_v42 = vsel %vm2652_vm5, %v2525_v63, %v2527_v41 }
0x27ae   :  { %1913 = vrot.lane.b32.xlu0 %v1910_v42, %s2532_s3  ;;  %v1911_v58 = vmul.f32 %v1910_v42, %v1820_v32 }
0x2820   :  { %v1914_v43 = vpop.permute.xlu0 %1913 }
0x2821   :  { %v1916_v48 = vmul.f32 %v1914_v43, %v1910_v42 }
0x2823   :  { %1918 = vrot.lane.b32.xlu1 %v1916_v48, %s2533_s23 }
0x2895   :  { %v1919_v59 = vpop.permute.xlu1 %1918 }
0x2896   :  { %v1921_v49 = vadd.f32 %v1919_v59, %v1911_v58 }
0x2898   :  { %2528 = vtanh.f32 %v1921_v49 }
0x28a5   :  { %v2529_v53 = vpop.eup %2528 }
0x28a6   :  { %1924 = vrot.lane.b32.xlu0 %v2529_v53, %s2532_s3 }
0x2918   :  { %v1925_v56 = vpop.permute.xlu0 %1924 }
0x2919   :  { %v1927_v1 = vmul.f32 %v1925_v56, %v1910_v42 }
0x291b   :  { %1940 = vrot.lane.b32.xlu1 %v1927_v1, %s2533_s23 }
0x298d   :  { %v1941_v3 = vpop.permute.xlu1 %1940 }
0x298e   :  { %2396 = vmatmul.mubr.msk.f32.vlgmr.msra.gmra.mxu0 %vm193_vm6, %v1941_v3 }
0x2a4e   :  { %v2010_v8 = vpop.f32.mrf.mxu0 }
0x2a4f   :  { %v2011_v0 = vadd.f32 %v2069_v4, %v2010_v8 }
0x2a50   :  { %v2397_v9 = vpop.f32.mrf.mxu0 }
0x2a51   :  { %2015 = vst.msk [vmem:[%s3062_s9] sm:$0xff] %vm2014_vm7, %v2011_v0 }

</bundles_post_ra>
